<compile_context>
chip_gen: v7x
topology: tpu7x:2x2x1
jax: 0.10.0
libtpu: 0.0.40
codegen_flags: <defaults>
</compile_context>

<pallas_src>
import functools

import jax
import jax.numpy as jnp
from jax.experimental import pallas as pl
from jax.experimental.pallas import tpu as pltpu


# ------------------------------ Fused kernel ----------------------------------

def _denoise_kernel(x_ref, mask_ref, w_in_ref, b_in_ref, w_mid_ref, b_mid_ref,
                    w_out_ref, b_out_ref, o_ref, *, H, W, C):
    hw = H * W

    # Channel-invariant per-tap validity masks, host-precomputed and DMA'd once
    # (constant index_map); nothing is rebuilt per grid step.
    mask = mask_ref[...]                                      # (9, hw) f32
    masks = tuple(mask[t:t + 1, :] for t in range(9))

    def conv3x3(x, w_rows, b, cout):
        """Zero-padded SAME 3x3 conv in transposed (Cout, H*W) orientation.

        x      : (Cin, hw)     f32 activation plane
        w_rows : (9*cout, Cin) bf16, rows ordered (tap = kh*3+kw, cout)
        b      : (cout, 1)     f32
        Each tap = pltpu.roll lane rotation of the flattened image, masked where
        the tap falls outside the image, then one small bf16 MXU matmul
        accumulated into an f32 accumulator (no im2col, no full-size mask).
        """
        acc = jnp.zeros((cout, hw), jnp.float32)
        for t in range(9):
            dy, dx = t // 3 - 1, t % 3 - 1
            s = dy * W + dx                                   # flattened tap offset
            xt = x if s == 0 else pltpu.roll(x, (-s) % hw, axis=1)
            xt = (xt * masks[t]).astype(jnp.bfloat16)         # mask f32, dot bf16
            acc = acc + jnp.dot(w_rows[t * cout:(t + 1) * cout, :], xt,
                                preferred_element_type=jnp.float32)
        return acc + b

    x = x_ref[0]                                              # (3, hw) f32

    # conv_in: 3 -> C
    cur0 = conv3x3(x, w_in_ref[...], b_in_ref[...], C)        # (C, hw) f32

    # 24 mid convs (4 RRG x 2 DAB x 3 conv): fori_loop with dynamic weight
    # indexing; ReLU / DAB-residual / RRG-residual gated by the layer index.
    def body(layer, carry):
        cur, dab_in, rrg_in = carry
        p3 = layer % 3                                        # position inside DAB
        p6 = layer % 6                                        # position inside RRG
        dab_in = jnp.where(p3 == 0, cur, dab_in)
        rrg_in = jnp.where(p6 == 0, cur, rrg_in)
        y = conv3x3(cur, w_mid_ref[layer], b_mid_ref[layer], C)
        y = jnp.where(p3 != 2, jnp.maximum(y, 0.0), y)        # ReLU on conv1/conv2
        y = jnp.where(p3 == 2, y + dab_in, y)                 # DAB residual
        y = jnp.where(p6 == 5, y + rrg_in, y)                 # RRG residual
        return y, dab_in, rrg_in

    cur, _, _ = jax.lax.fori_loop(0, 24, body, (cur0, cur0, cur0))

    # conv_out: C -> 3; lane-dense (3, hw) store.
    o_ref[0] = conv3x3(cur, w_out_ref[...], b_out_ref[...], 3).astype(o_ref.dtype)


# ------------------------------ Host wrapper -----------------------------------

def denoising_network(x_nchw, params):
    """x: (N, 3, H, W) float32 NCHW (like the PyTorch module). Returns same shape."""
    N, _, H, W = x_nchw.shape
    C = params["conv_in_w"].shape[0]                          # OIHW: (C, 3, 3, 3)
    hw = H * W

    # Lane-dense I/O: NCHW -> (N, 3, H*W) is a pure reshape (no transpose).
    x = x_nchw.reshape(N, 3, hw)

    def prep_w(w_oihw):
        # PyTorch OIHW (cout, cin, kh, kw) -> (9*cout, cin) bf16,
        # rows ordered (tap = kh*3+kw, cout); matches the kernel's per-tap slices.
        co, ci = w_oihw.shape[0], w_oihw.shape[1]
        return (jnp.transpose(w_oihw, (2, 3, 0, 1))
                .reshape(9 * co, ci).astype(jnp.bfloat16))

    def prep_b(b):
        return b.reshape(-1, 1).astype(jnp.float32)

    w_in, b_in = prep_w(params["conv_in_w"]), prep_b(params["conv_in_b"])
    w_out, b_out = prep_w(params["conv_out_w"]), prep_b(params["conv_out_b"])
    w_mid, b_mid = [], []
    for i in range(1, 5):
        rrg = params[f"rrg{i}"]
        for dab in ("dab1", "dab2"):
            p = rrg[dab]
            for j in (1, 2, 3):
                w_mid.append(prep_w(p[f"w{j}"]))
                b_mid.append(prep_b(p[f"b{j}"]))
    w_mid = jnp.stack(w_mid)                                  # (24, 9*C, C) bf16
    b_mid = jnp.stack(b_mid)                                  # (24, C, 1)   f32

    # Per-tap validity masks (channel-invariant), computed ONCE on the host.
    ii = jnp.arange(hw, dtype=jnp.int32)
    h, w = ii // W, ii % W
    mask = jnp.stack([
        ((h + dy >= 0) & (h + dy < H) & (w + dx >= 0) & (w + dx < W))
        for dy in (-1, 0, 1) for dx in (-1, 0, 1)
    ]).astype(jnp.float32)                                    # (9, hw)

    kernel = functools.partial(_denoise_kernel, H=H, W=W, C=C)
    out = pl.pallas_call(
        kernel,
        out_shape=jax.ShapeDtypeStruct((N, 3, hw), jnp.float32),
        grid=(N,),
        in_specs=[
            pl.BlockSpec((1, 3, hw), lambda n: (n, 0, 0)),        # image n
            pl.BlockSpec((9, hw), lambda n: (0, 0)),              # tap masks
            pl.BlockSpec((9 * C, 3), lambda n: (0, 0)),           # conv_in w
            pl.BlockSpec((C, 1), lambda n: (0, 0)),               # conv_in b
            pl.BlockSpec((24, 9 * C, C), lambda n: (0, 0, 0)),    # 24 mid conv w
            pl.BlockSpec((24, C, 1), lambda n: (0, 0, 0)),        # 24 mid conv b
            pl.BlockSpec((9 * 3, C), lambda n: (0, 0)),           # conv_out w
            pl.BlockSpec((3, 1), lambda n: (0, 0)),               # conv_out b
        ],
        out_specs=pl.BlockSpec((1, 3, hw), lambda n: (n, 0, 0)),
        compiler_params=pltpu.CompilerParams(
            dimension_semantics=("parallel",),   # >=2 images -> both v7x TCs
            # Sized with headroom; never claim the full physical VMEM (v7x: 64 MiB).
            vmem_limit_bytes=32 * 1024 * 1024,
        ),
    )(x, mask, w_in, b_in, w_mid, b_mid, w_out, b_out)

    return out.reshape(N, 3, H, W)


# --------------------------- Parameter init ------------------------------------
# Weights are kept in PyTorch Conv2d OIHW layout (cout, cin, kh, kw); the wrapper
# (not the init) converts them to the kernel layout, so real checkpoints can be
# dropped in without silent layout bugs.

def _init_conv(key, cin, cout):
    kw, kb = jax.random.split(key)
    bound = 1.0 / jnp.sqrt(cin * 9.0)
    w = jax.random.uniform(kw, (cout, cin, 3, 3), jnp.float32, -bound, bound)
    b = jax.random.uniform(kb, (cout,), jnp.float32, -bound, bound)
    return w, b


def init_params(key, channels):
    keys = iter(jax.random.split(key, 32))
    params = {}
    params["conv_in_w"], params["conv_in_b"] = _init_conv(next(keys), 3, channels)
    for i in range(1, 5):
        rrg = {}
        for dab in ("dab1", "dab2"):
            w1, b1 = _init_conv(next(keys), channels, channels)
            w2, b2 = _init_conv(next(keys), channels, channels)
            w3, b3 = _init_conv(next(keys), channels, channels)
            rrg[dab] = {"w1": w1, "b1": b1, "w2": w2, "b2": b2, "w3": w3, "b3": b3}
        params[f"rrg{i}"] = rrg
    params["conv_out_w"], params["conv_out_b"] = _init_conv(next(keys), channels, 3)
    return params


# ------------------------------ Reference ---------------------------------------

def _conv_ref(x, w, b):
    out = jax.lax.conv_general_dilated(
        x, w, window_strides=(1, 1), padding="SAME",
        dimension_numbers=("NCHW", "OIHW", "NCHW"))
    return out + b.reshape(1, -1, 1, 1)


def denoising_network_ref(x, params):
    def dab(x, p):
        o = jax.nn.relu(_conv_ref(x, p["w1"], p["b1"]))
        o = jax.nn.relu(_conv_ref(o, p["w2"], p["b2"]))
        o = _conv_ref(o, p["w3"], p["b3"])
        return o + x

    out = _conv_ref(x, params["conv_in_w"], params["conv_in_b"])
    for i in range(1, 5):
        r = params[f"rrg{i}"]
        out = dab(dab(out, r["dab1"]), r["dab2"]) + out
    return _conv_ref(out, params["conv_out_w"], params["conv_out_b"])


# --------------------------------- Main ------------------------------------------

if __name__ == "__main__":
    key = jax.random.PRNGKey(0)
    k_params, k_x = jax.random.split(key)

    channels = 16   # small version of the default 64-channel network
    N, H, W = 2, 16, 16

    params = init_params(k_params, channels)
    x = jax.random.normal(k_x, (N, 3, H, W), jnp.float32)   # NCHW like PyTorch

    out = jax.block_until_ready(jax.jit(denoising_network)(x, params))
    ref = jax.block_until_ready(denoising_network_ref(x, params))

    assert out.shape == (N, 3, H, W)
    # bf16 MXU operands over 26 layers with 4 doubling residual stages:
    # check max error relative to the reference's own scale.
    max_err = float(jnp.max(jnp.abs(out - ref)))
    scale = float(jnp.max(jnp.abs(ref)))
    assert max_err <= 2e-2 * scale + 1e-3, (max_err, scale)

    print("KERNEL_OK")
</pallas_src>

<mosaic_0001>
module attributes {stable_mosaic.version = 11 : i64} {
  func.func @_denoise_kernel(%arg0: i32, %arg1: memref<1x3x256xf32, #tpu.memory_space<vmem>>, %arg2: memref<9x256xf32, #tpu.memory_space<vmem>>, %arg3: memref<144x3xbf16, #tpu.memory_space<vmem>>, %arg4: memref<16x1xf32, #tpu.memory_space<vmem>>, %arg5: memref<24x144x16xbf16, #tpu.memory_space<vmem>>, %arg6: memref<24x16x1xf32, #tpu.memory_space<vmem>>, %arg7: memref<27x16xbf16, #tpu.memory_space<vmem>>, %arg8: memref<3x1xf32, #tpu.memory_space<vmem>>, %arg9: memref<1x3x256xf32, #tpu.memory_space<vmem>>) attributes {dimension_semantics = [#tpu.dimension_semantics<parallel>], iteration_bounds = array<i64: 2>, scalar_prefetch = 0 : i64, scratch_operands = 0 : i64, tpu.core_type = #tpu.core_type<tc>, window_params = [{transform_indices = @transform_0, window_bounds = array<i64: 1, 3, 256>}, {pipeline_mode = #tpu.pipeline_mode<synchronous>, transform_indices = @transform_1, window_bounds = array<i64: 9, 256>}, {pipeline_mode = #tpu.pipeline_mode<synchronous>, transform_indices = @transform_2, window_bounds = array<i64: 144, 3>}, {pipeline_mode = #tpu.pipeline_mode<synchronous>, transform_indices = @transform_3, window_bounds = array<i64: 16, 1>}, {pipeline_mode = #tpu.pipeline_mode<synchronous>, transform_indices = @transform_4, window_bounds = array<i64: 24, 144, 16>}, {pipeline_mode = #tpu.pipeline_mode<synchronous>, transform_indices = @transform_5, window_bounds = array<i64: 24, 16, 1>}, {pipeline_mode = #tpu.pipeline_mode<synchronous>, transform_indices = @transform_6, window_bounds = array<i64: 27, 16>}, {pipeline_mode = #tpu.pipeline_mode<synchronous>, transform_indices = @transform_7, window_bounds = array<i64: 3, 1>}, {transform_indices = @transform_8, window_bounds = array<i64: 1, 3, 256>}]} {
    %c0 = arith.constant 0 : index
    %c0_0 = arith.constant 0 : index
    %0 = vector.load %arg2[%c0, %c0_0] : memref<9x256xf32, #tpu.memory_space<vmem>>, vector<9x256xf32>
    %1 = vector.extract_strided_slice %0 {offsets = [0, 0], sizes = [1, 256], strides = [1, 1]} : vector<9x256xf32> to vector<1x256xf32>
    %2 = vector.extract_strided_slice %0 {offsets = [1, 0], sizes = [1, 256], strides = [1, 1]} : vector<9x256xf32> to vector<1x256xf32>
    %3 = vector.extract_strided_slice %0 {offsets = [2, 0], sizes = [1, 256], strides = [1, 1]} : vector<9x256xf32> to vector<1x256xf32>
    %4 = vector.extract_strided_slice %0 {offsets = [3, 0], sizes = [1, 256], strides = [1, 1]} : vector<9x256xf32> to vector<1x256xf32>
    %5 = vector.extract_strided_slice %0 {offsets = [4, 0], sizes = [1, 256], strides = [1, 1]} : vector<9x256xf32> to vector<1x256xf32>
    %6 = vector.extract_strided_slice %0 {offsets = [5, 0], sizes = [1, 256], strides = [1, 1]} : vector<9x256xf32> to vector<1x256xf32>
    %7 = vector.extract_strided_slice %0 {offsets = [6, 0], sizes = [1, 256], strides = [1, 1]} : vector<9x256xf32> to vector<1x256xf32>
    %8 = vector.extract_strided_slice %0 {offsets = [7, 0], sizes = [1, 256], strides = [1, 1]} : vector<9x256xf32> to vector<1x256xf32>
    %9 = vector.extract_strided_slice %0 {offsets = [8, 0], sizes = [1, 256], strides = [1, 1]} : vector<9x256xf32> to vector<1x256xf32>
    %c0_1 = arith.constant 0 : index
    %c0_2 = arith.constant 0 : index
    %c0_3 = arith.constant 0 : index
    %10 = vector.load %arg1[%c0_1, %c0_2, %c0_3] : memref<1x3x256xf32, #tpu.memory_space<vmem>>, vector<1x3x256xf32>
    %11 = vector.shape_cast %10 : vector<1x3x256xf32> to vector<3x256xf32>
    %c0_4 = arith.constant 0 : index
    %c0_5 = arith.constant 0 : index
    %12 = vector.load %arg3[%c0_4, %c0_5] : memref<144x3xbf16, #tpu.memory_space<vmem>>, vector<144x3xbf16>
    %c0_6 = arith.constant 0 : index
    %c0_7 = arith.constant 0 : index
    %13 = vector.load %arg4[%c0_6, %c0_7] : memref<16x1xf32, #tpu.memory_space<vmem>>, vector<16x1xf32>
    %cst = arith.constant 0.000000e+00 : f32
    %14 = vector.broadcast %cst : f32 to vector<16x256xf32>
    %c17_i32 = arith.constant 17 : i32
    %15 = tpu.dynamic_rotate %11 by %c17_i32 dim 1 : vector<3x256xf32>, i32 -> vector<3x256xf32>
    %16 = vector.broadcast %1 : vector<1x256xf32> to vector<3x256xf32>
    %17 = arith.mulf %15, %16 : vector<3x256xf32>
    %18 = arith.truncf %17 : vector<3x256xf32> to vector<3x256xbf16>
    %19 = vector.extract_strided_slice %12 {offsets = [0, 0], sizes = [16, 3], strides = [1, 1]} : vector<144x3xbf16> to vector<16x3xbf16>
    %cst_8 = arith.constant dense<0.000000e+00> : vector<16x256xf32>
    %20 = tpu.matmul %19, %18, %cst_8 {dimension_numbers = #tpu.dot_dimension_numbers<[1], [0], [0], [1], [0, 0, 1, 1], [], []>} : vector<16x3xbf16>, vector<3x256xbf16>, vector<16x256xf32> -> vector<16x256xf32>
    %21 = arith.addf %14, %20 : vector<16x256xf32>
    %c16_i32 = arith.constant 16 : i32
    %22 = tpu.dynamic_rotate %11 by %c16_i32 dim 1 : vector<3x256xf32>, i32 -> vector<3x256xf32>
    %23 = vector.broadcast %2 : vector<1x256xf32> to vector<3x256xf32>
    %24 = arith.mulf %22, %23 : vector<3x256xf32>
    %25 = arith.truncf %24 : vector<3x256xf32> to vector<3x256xbf16>
    %26 = vector.extract_strided_slice %12 {offsets = [16, 0], sizes = [16, 3], strides = [1, 1]} : vector<144x3xbf16> to vector<16x3xbf16>
    %cst_9 = arith.constant dense<0.000000e+00> : vector<16x256xf32>
    %27 = tpu.matmul %26, %25, %cst_9 {dimension_numbers = #tpu.dot_dimension_numbers<[1], [0], [0], [1], [0, 0, 1, 1], [], []>} : vector<16x3xbf16>, vector<3x256xbf16>, vector<16x256xf32> -> vector<16x256xf32>
    %28 = arith.addf %21, %27 : vector<16x256xf32>
    %c15_i32 = arith.constant 15 : i32
    %29 = tpu.dynamic_rotate %11 by %c15_i32 dim 1 : vector<3x256xf32>, i32 -> vector<3x256xf32>
    %30 = vector.broadcast %3 : vector<1x256xf32> to vector<3x256xf32>
    %31 = arith.mulf %29, %30 : vector<3x256xf32>
    %32 = arith.truncf %31 : vector<3x256xf32> to vector<3x256xbf16>
    %33 = vector.extract_strided_slice %12 {offsets = [32, 0], sizes = [16, 3], strides = [1, 1]} : vector<144x3xbf16> to vector<16x3xbf16>
    %cst_10 = arith.constant dense<0.000000e+00> : vector<16x256xf32>
    %34 = tpu.matmul %33, %32, %cst_10 {dimension_numbers = #tpu.dot_dimension_numbers<[1], [0], [0], [1], [0, 0, 1, 1], [], []>} : vector<16x3xbf16>, vector<3x256xbf16>, vector<16x256xf32> -> vector<16x256xf32>
    %35 = arith.addf %28, %34 : vector<16x256xf32>
    %c1_i32 = arith.constant 1 : i32
    %36 = tpu.dynamic_rotate %11 by %c1_i32 dim 1 : vector<3x256xf32>, i32 -> vector<3x256xf32>
    %37 = vector.broadcast %4 : vector<1x256xf32> to vector<3x256xf32>
    %38 = arith.mulf %36, %37 : vector<3x256xf32>
    %39 = arith.truncf %38 : vector<3x256xf32> to vector<3x256xbf16>
    %40 = vector.extract_strided_slice %12 {offsets = [48, 0], sizes = [16, 3], strides = [1, 1]} : vector<144x3xbf16> to vector<16x3xbf16>
    %cst_11 = arith.constant dense<0.000000e+00> : vector<16x256xf32>
    %41 = tpu.matmul %40, %39, %cst_11 {dimension_numbers = #tpu.dot_dimension_numbers<[1], [0], [0], [1], [0, 0, 1, 1], [], []>} : vector<16x3xbf16>, vector<3x256xbf16>, vector<16x256xf32> -> vector<16x256xf32>
    %42 = arith.addf %35, %41 : vector<16x256xf32>
    %43 = vector.broadcast %5 : vector<1x256xf32> to vector<3x256xf32>
    %44 = arith.mulf %11, %43 : vector<3x256xf32>
    %45 = arith.truncf %44 : vector<3x256xf32> to vector<3x256xbf16>
    %46 = vector.extract_strided_slice %12 {offsets = [64, 0], sizes = [16, 3], strides = [1, 1]} : vector<144x3xbf16> to vector<16x3xbf16>
    %cst_12 = arith.constant dense<0.000000e+00> : vector<16x256xf32>
    %47 = tpu.matmul %46, %45, %cst_12 {dimension_numbers = #tpu.dot_dimension_numbers<[1], [0], [0], [1], [0, 0, 1, 1], [], []>} : vector<16x3xbf16>, vector<3x256xbf16>, vector<16x256xf32> -> vector<16x256xf32>
    %48 = arith.addf %42, %47 : vector<16x256xf32>
    %c255_i32 = arith.constant 255 : i32
    %49 = tpu.dynamic_rotate %11 by %c255_i32 dim 1 : vector<3x256xf32>, i32 -> vector<3x256xf32>
    %50 = vector.broadcast %6 : vector<1x256xf32> to vector<3x256xf32>
    %51 = arith.mulf %49, %50 : vector<3x256xf32>
    %52 = arith.truncf %51 : vector<3x256xf32> to vector<3x256xbf16>
    %53 = vector.extract_strided_slice %12 {offsets = [80, 0], sizes = [16, 3], strides = [1, 1]} : vector<144x3xbf16> to vector<16x3xbf16>
    %cst_13 = arith.constant dense<0.000000e+00> : vector<16x256xf32>
    %54 = tpu.matmul %53, %52, %cst_13 {dimension_numbers = #tpu.dot_dimension_numbers<[1], [0], [0], [1], [0, 0, 1, 1], [], []>} : vector<16x3xbf16>, vector<3x256xbf16>, vector<16x256xf32> -> vector<16x256xf32>
    %55 = arith.addf %48, %54 : vector<16x256xf32>
    %c241_i32 = arith.constant 241 : i32
    %56 = tpu.dynamic_rotate %11 by %c241_i32 dim 1 : vector<3x256xf32>, i32 -> vector<3x256xf32>
    %57 = vector.broadcast %7 : vector<1x256xf32> to vector<3x256xf32>
    %58 = arith.mulf %56, %57 : vector<3x256xf32>
    %59 = arith.truncf %58 : vector<3x256xf32> to vector<3x256xbf16>
    %60 = vector.extract_strided_slice %12 {offsets = [96, 0], sizes = [16, 3], strides = [1, 1]} : vector<144x3xbf16> to vector<16x3xbf16>
    %cst_14 = arith.constant dense<0.000000e+00> : vector<16x256xf32>
    %61 = tpu.matmul %60, %59, %cst_14 {dimension_numbers = #tpu.dot_dimension_numbers<[1], [0], [0], [1], [0, 0, 1, 1], [], []>} : vector<16x3xbf16>, vector<3x256xbf16>, vector<16x256xf32> -> vector<16x256xf32>
    %62 = arith.addf %55, %61 : vector<16x256xf32>
    %c240_i32 = arith.constant 240 : i32
    %63 = tpu.dynamic_rotate %11 by %c240_i32 dim 1 : vector<3x256xf32>, i32 -> vector<3x256xf32>
    %64 = vector.broadcast %8 : vector<1x256xf32> to vector<3x256xf32>
    %65 = arith.mulf %63, %64 : vector<3x256xf32>
    %66 = arith.truncf %65 : vector<3x256xf32> to vector<3x256xbf16>
    %67 = vector.extract_strided_slice %12 {offsets = [112, 0], sizes = [16, 3], strides = [1, 1]} : vector<144x3xbf16> to vector<16x3xbf16>
    %cst_15 = arith.constant dense<0.000000e+00> : vector<16x256xf32>
    %68 = tpu.matmul %67, %66, %cst_15 {dimension_numbers = #tpu.dot_dimension_numbers<[1], [0], [0], [1], [0, 0, 1, 1], [], []>} : vector<16x3xbf16>, vector<3x256xbf16>, vector<16x256xf32> -> vector<16x256xf32>
    %69 = arith.addf %62, %68 : vector<16x256xf32>
    %c239_i32 = arith.constant 239 : i32
    %70 = tpu.dynamic_rotate %11 by %c239_i32 dim 1 : vector<3x256xf32>, i32 -> vector<3x256xf32>
    %71 = vector.broadcast %9 : vector<1x256xf32> to vector<3x256xf32>
    %72 = arith.mulf %70, %71 : vector<3x256xf32>
    %73 = arith.truncf %72 : vector<3x256xf32> to vector<3x256xbf16>
    %74 = vector.extract_strided_slice %12 {offsets = [128, 0], sizes = [16, 3], strides = [1, 1]} : vector<144x3xbf16> to vector<16x3xbf16>
    %cst_16 = arith.constant dense<0.000000e+00> : vector<16x256xf32>
    %75 = tpu.matmul %74, %73, %cst_16 {dimension_numbers = #tpu.dot_dimension_numbers<[1], [0], [0], [1], [0, 0, 1, 1], [], []>} : vector<16x3xbf16>, vector<3x256xbf16>, vector<16x256xf32> -> vector<16x256xf32>
    %76 = arith.addf %69, %75 : vector<16x256xf32>
    %77 = vector.broadcast %13 : vector<16x1xf32> to vector<16x256xf32>
    %78 = arith.addf %76, %77 : vector<16x256xf32>
    %c0_i32 = arith.constant 0 : i32
    %c24_i32 = arith.constant 24 : i32
    %79 = arith.addi %c0_i32, %c24_i32 : i32
    %c1_i32_17 = arith.constant 1 : i32
    %80:3 = scf.for %arg10 = %c0_i32 to %79 step %c1_i32_17 iter_args(%arg11 = %78, %arg12 = %78, %arg13 = %78) -> (vector<16x256xf32>, vector<16x256xf32>, vector<16x256xf32>)  : i32 {
      %c3_i32 = arith.constant 3 : i32
      %c0_i32_44 = arith.constant 0 : i32
      %151 = arith.cmpi eq, %c3_i32, %c0_i32_44 : i32
      %c1_i32_45 = arith.constant 1 : i32
      %152 = arith.select %151, %c1_i32_45, %c3_i32 : i32
      %153 = arith.remsi %arg10, %152 : i32
      %c0_i32_46 = arith.constant 0 : i32
      %154 = arith.cmpi ne, %153, %c0_i32_46 : i32
      %c0_i32_47 = arith.constant 0 : i32
      %155 = arith.cmpi slt, %153, %c0_i32_47 : i32
      %c0_i32_48 = arith.constant 0 : i32
      %156 = arith.cmpi slt, %152, %c0_i32_48 : i32
      %157 = arith.xori %155, %156 : i1
      %158 = arith.andi %157, %154 : i1
      %159 = arith.addi %153, %152 : i32
      %160 = arith.select %158, %159, %153 : i32
      %c6_i32 = arith.constant 6 : i32
      %c0_i32_49 = arith.constant 0 : i32
      %161 = arith.cmpi eq, %c6_i32, %c0_i32_49 : i32
      %c1_i32_50 = arith.constant 1 : i32
      %162 = arith.select %161, %c1_i32_50, %c6_i32 : i32
      %163 = arith.remsi %arg10, %162 : i32
      %c0_i32_51 = arith.constant 0 : i32
      %164 = arith.cmpi ne, %163, %c0_i32_51 : i32
      %c0_i32_52 = arith.constant 0 : i32
      %165 = arith.cmpi slt, %163, %c0_i32_52 : i32
      %c0_i32_53 = arith.constant 0 : i32
      %166 = arith.cmpi slt, %162, %c0_i32_53 : i32
      %167 = arith.xori %165, %166 : i1
      %168 = arith.andi %167, %164 : i1
      %169 = arith.addi %163, %162 : i32
      %170 = arith.select %168, %169, %163 : i32
      %c0_i32_54 = arith.constant 0 : i32
      %171 = arith.cmpi eq, %160, %c0_i32_54 : i32
      %172 = arith.select %171, %arg11, %arg12 : vector<16x256xf32>
      %c0_i32_55 = arith.constant 0 : i32
      %173 = arith.cmpi eq, %170, %c0_i32_55 : i32
      %174 = arith.select %173, %arg11, %arg13 : vector<16x256xf32>
      %175 = arith.index_cast %arg10 : i32 to index
      %c0_56 = arith.constant 0 : index
      %c0_57 = arith.constant 0 : index
      %176 = vector.load %arg5[%175, %c0_56, %c0_57] : memref<24x144x16xbf16, #tpu.memory_space<vmem>>, vector<1x144x16xbf16>
      %177 = vector.shape_cast %176 : vector<1x144x16xbf16> to vector<144x16xbf16>
      %178 = arith.index_cast %arg10 : i32 to index
      %c0_58 = arith.constant 0 : index
      %c0_59 = arith.constant 0 : index
      %179 = vector.load %arg6[%178, %c0_58, %c0_59] : memref<24x16x1xf32, #tpu.memory_space<vmem>>, vector<1x16x1xf32>
      %180 = vector.shape_cast %179 : vector<1x16x1xf32> to vector<16x1xf32>
      %cst_60 = arith.constant 0.000000e+00 : f32
      %181 = vector.broadcast %cst_60 : f32 to vector<16x256xf32>
      %c17_i32_61 = arith.constant 17 : i32
      %182 = tpu.dynamic_rotate %arg11 by %c17_i32_61 dim 1 : vector<16x256xf32>, i32 -> vector<16x256xf32>
      %183 = vector.broadcast %1 : vector<1x256xf32> to vector<16x256xf32>
      %184 = arith.mulf %182, %183 : vector<16x256xf32>
      %185 = arith.truncf %184 : vector<16x256xf32> to vector<16x256xbf16>
      %186 = vector.extract_strided_slice %177 {offsets = [0, 0], sizes = [16, 16], strides = [1, 1]} : vector<144x16xbf16> to vector<16x16xbf16>
      %cst_62 = arith.constant dense<0.000000e+00> : vector<16x256xf32>
      %187 = tpu.matmul %186, %185, %cst_62 {dimension_numbers = #tpu.dot_dimension_numbers<[1], [0], [0], [1], [0, 0, 1, 1], [], []>} : vector<16x16xbf16>, vector<16x256xbf16>, vector<16x256xf32> -> vector<16x256xf32>
      %188 = arith.addf %181, %187 : vector<16x256xf32>
      %c16_i32_63 = arith.constant 16 : i32
      %189 = tpu.dynamic_rotate %arg11 by %c16_i32_63 dim 1 : vector<16x256xf32>, i32 -> vector<16x256xf32>
      %190 = vector.broadcast %2 : vector<1x256xf32> to vector<16x256xf32>
      %191 = arith.mulf %189, %190 : vector<16x256xf32>
      %192 = arith.truncf %191 : vector<16x256xf32> to vector<16x256xbf16>
      %193 = vector.extract_strided_slice %177 {offsets = [16, 0], sizes = [16, 16], strides = [1, 1]} : vector<144x16xbf16> to vector<16x16xbf16>
      %cst_64 = arith.constant dense<0.000000e+00> : vector<16x256xf32>
      %194 = tpu.matmul %193, %192, %cst_64 {dimension_numbers = #tpu.dot_dimension_numbers<[1], [0], [0], [1], [0, 0, 1, 1], [], []>} : vector<16x16xbf16>, vector<16x256xbf16>, vector<16x256xf32> -> vector<16x256xf32>
      %195 = arith.addf %188, %194 : vector<16x256xf32>
      %c15_i32_65 = arith.constant 15 : i32
      %196 = tpu.dynamic_rotate %arg11 by %c15_i32_65 dim 1 : vector<16x256xf32>, i32 -> vector<16x256xf32>
      %197 = vector.broadcast %3 : vector<1x256xf32> to vector<16x256xf32>
      %198 = arith.mulf %196, %197 : vector<16x256xf32>
      %199 = arith.truncf %198 : vector<16x256xf32> to vector<16x256xbf16>
      %200 = vector.extract_strided_slice %177 {offsets = [32, 0], sizes = [16, 16], strides = [1, 1]} : vector<144x16xbf16> to vector<16x16xbf16>
      %cst_66 = arith.constant dense<0.000000e+00> : vector<16x256xf32>
      %201 = tpu.matmul %200, %199, %cst_66 {dimension_numbers = #tpu.dot_dimension_numbers<[1], [0], [0], [1], [0, 0, 1, 1], [], []>} : vector<16x16xbf16>, vector<16x256xbf16>, vector<16x256xf32> -> vector<16x256xf32>
      %202 = arith.addf %195, %201 : vector<16x256xf32>
      %c1_i32_67 = arith.constant 1 : i32
      %203 = tpu.dynamic_rotate %arg11 by %c1_i32_67 dim 1 : vector<16x256xf32>, i32 -> vector<16x256xf32>
      %204 = vector.broadcast %4 : vector<1x256xf32> to vector<16x256xf32>
      %205 = arith.mulf %203, %204 : vector<16x256xf32>
      %206 = arith.truncf %205 : vector<16x256xf32> to vector<16x256xbf16>
      %207 = vector.extract_strided_slice %177 {offsets = [48, 0], sizes = [16, 16], strides = [1, 1]} : vector<144x16xbf16> to vector<16x16xbf16>
      %cst_68 = arith.constant dense<0.000000e+00> : vector<16x256xf32>
      %208 = tpu.matmul %207, %206, %cst_68 {dimension_numbers = #tpu.dot_dimension_numbers<[1], [0], [0], [1], [0, 0, 1, 1], [], []>} : vector<16x16xbf16>, vector<16x256xbf16>, vector<16x256xf32> -> vector<16x256xf32>
      %209 = arith.addf %202, %208 : vector<16x256xf32>
      %210 = vector.broadcast %5 : vector<1x256xf32> to vector<16x256xf32>
      %211 = arith.mulf %arg11, %210 : vector<16x256xf32>
      %212 = arith.truncf %211 : vector<16x256xf32> to vector<16x256xbf16>
      %213 = vector.extract_strided_slice %177 {offsets = [64, 0], sizes = [16, 16], strides = [1, 1]} : vector<144x16xbf16> to vector<16x16xbf16>
      %cst_69 = arith.constant dense<0.000000e+00> : vector<16x256xf32>
      %214 = tpu.matmul %213, %212, %cst_69 {dimension_numbers = #tpu.dot_dimension_numbers<[1], [0], [0], [1], [0, 0, 1, 1], [], []>} : vector<16x16xbf16>, vector<16x256xbf16>, vector<16x256xf32> -> vector<16x256xf32>
      %215 = arith.addf %209, %214 : vector<16x256xf32>
      %c255_i32_70 = arith.constant 255 : i32
      %216 = tpu.dynamic_rotate %arg11 by %c255_i32_70 dim 1 : vector<16x256xf32>, i32 -> vector<16x256xf32>
      %217 = vector.broadcast %6 : vector<1x256xf32> to vector<16x256xf32>
      %218 = arith.mulf %216, %217 : vector<16x256xf32>
      %219 = arith.truncf %218 : vector<16x256xf32> to vector<16x256xbf16>
      %220 = vector.extract_strided_slice %177 {offsets = [80, 0], sizes = [16, 16], strides = [1, 1]} : vector<144x16xbf16> to vector<16x16xbf16>
      %cst_71 = arith.constant dense<0.000000e+00> : vector<16x256xf32>
      %221 = tpu.matmul %220, %219, %cst_71 {dimension_numbers = #tpu.dot_dimension_numbers<[1], [0], [0], [1], [0, 0, 1, 1], [], []>} : vector<16x16xbf16>, vector<16x256xbf16>, vector<16x256xf32> -> vector<16x256xf32>
      %222 = arith.addf %215, %221 : vector<16x256xf32>
      %c241_i32_72 = arith.constant 241 : i32
      %223 = tpu.dynamic_rotate %arg11 by %c241_i32_72 dim 1 : vector<16x256xf32>, i32 -> vector<16x256xf32>
      %224 = vector.broadcast %7 : vector<1x256xf32> to vector<16x256xf32>
      %225 = arith.mulf %223, %224 : vector<16x256xf32>
      %226 = arith.truncf %225 : vector<16x256xf32> to vector<16x256xbf16>
      %227 = vector.extract_strided_slice %177 {offsets = [96, 0], sizes = [16, 16], strides = [1, 1]} : vector<144x16xbf16> to vector<16x16xbf16>
      %cst_73 = arith.constant dense<0.000000e+00> : vector<16x256xf32>
      %228 = tpu.matmul %227, %226, %cst_73 {dimension_numbers = #tpu.dot_dimension_numbers<[1], [0], [0], [1], [0, 0, 1, 1], [], []>} : vector<16x16xbf16>, vector<16x256xbf16>, vector<16x256xf32> -> vector<16x256xf32>
      %229 = arith.addf %222, %228 : vector<16x256xf32>
      %c240_i32_74 = arith.constant 240 : i32
      %230 = tpu.dynamic_rotate %arg11 by %c240_i32_74 dim 1 : vector<16x256xf32>, i32 -> vector<16x256xf32>
      %231 = vector.broadcast %8 : vector<1x256xf32> to vector<16x256xf32>
      %232 = arith.mulf %230, %231 : vector<16x256xf32>
      %233 = arith.truncf %232 : vector<16x256xf32> to vector<16x256xbf16>
      %234 = vector.extract_strided_slice %177 {offsets = [112, 0], sizes = [16, 16], strides = [1, 1]} : vector<144x16xbf16> to vector<16x16xbf16>
      %cst_75 = arith.constant dense<0.000000e+00> : vector<16x256xf32>
      %235 = tpu.matmul %234, %233, %cst_75 {dimension_numbers = #tpu.dot_dimension_numbers<[1], [0], [0], [1], [0, 0, 1, 1], [], []>} : vector<16x16xbf16>, vector<16x256xbf16>, vector<16x256xf32> -> vector<16x256xf32>
      %236 = arith.addf %229, %235 : vector<16x256xf32>
      %c239_i32_76 = arith.constant 239 : i32
      %237 = tpu.dynamic_rotate %arg11 by %c239_i32_76 dim 1 : vector<16x256xf32>, i32 -> vector<16x256xf32>
      %238 = vector.broadcast %9 : vector<1x256xf32> to vector<16x256xf32>
      %239 = arith.mulf %237, %238 : vector<16x256xf32>
      %240 = arith.truncf %239 : vector<16x256xf32> to vector<16x256xbf16>
      %241 = vector.extract_strided_slice %177 {offsets = [128, 0], sizes = [16, 16], strides = [1, 1]} : vector<144x16xbf16> to vector<16x16xbf16>
      %cst_77 = arith.constant dense<0.000000e+00> : vector<16x256xf32>
      %242 = tpu.matmul %241, %240, %cst_77 {dimension_numbers = #tpu.dot_dimension_numbers<[1], [0], [0], [1], [0, 0, 1, 1], [], []>} : vector<16x16xbf16>, vector<16x256xbf16>, vector<16x256xf32> -> vector<16x256xf32>
      %243 = arith.addf %236, %242 : vector<16x256xf32>
      %244 = vector.broadcast %180 : vector<16x1xf32> to vector<16x256xf32>
      %245 = arith.addf %243, %244 : vector<16x256xf32>
      %c2_i32 = arith.constant 2 : i32
      %246 = arith.cmpi ne, %160, %c2_i32 : i32
      %cst_78 = arith.constant 0.000000e+00 : f32
      %247 = vector.broadcast %cst_78 : f32 to vector<16x256xf32>
      %248 = arith.maximumf %245, %247 : vector<16x256xf32>
      %249 = arith.select %246, %248, %245 : vector<16x256xf32>
      %c2_i32_79 = arith.constant 2 : i32
      %250 = arith.cmpi eq, %160, %c2_i32_79 : i32
      %251 = arith.addf %249, %172 : vector<16x256xf32>
      %252 = arith.select %250, %251, %249 : vector<16x256xf32>
      %c5_i32 = arith.constant 5 : i32
      %253 = arith.cmpi eq, %170, %c5_i32 : i32
      %254 = arith.addf %252, %174 : vector<16x256xf32>
      %255 = arith.select %253, %254, %252 : vector<16x256xf32>
      scf.yield %255, %172, %174 : vector<16x256xf32>, vector<16x256xf32>, vector<16x256xf32>
    }
    %c24_i32_18 = arith.constant 24 : i32
    %c0_19 = arith.constant 0 : index
    %c0_20 = arith.constant 0 : index
    %81 = vector.load %arg7[%c0_19, %c0_20] : memref<27x16xbf16, #tpu.memory_space<vmem>>, vector<27x16xbf16>
    %c0_21 = arith.constant 0 : index
    %c0_22 = arith.constant 0 : index
    %82 = vector.load %arg8[%c0_21, %c0_22] : memref<3x1xf32, #tpu.memory_space<vmem>>, vector<3x1xf32>
    %cst_23 = arith.constant 0.000000e+00 : f32
    %83 = vector.broadcast %cst_23 : f32 to vector<3x256xf32>
    %c17_i32_24 = arith.constant 17 : i32
    %84 = tpu.dynamic_rotate %80#0 by %c17_i32_24 dim 1 : vector<16x256xf32>, i32 -> vector<16x256xf32>
    %85 = vector.broadcast %1 : vector<1x256xf32> to vector<16x256xf32>
    %86 = arith.mulf %84, %85 : vector<16x256xf32>
    %87 = arith.truncf %86 : vector<16x256xf32> to vector<16x256xbf16>
    %88 = vector.extract_strided_slice %81 {offsets = [0, 0], sizes = [3, 16], strides = [1, 1]} : vector<27x16xbf16> to vector<3x16xbf16>
    %cst_25 = arith.constant dense<0.000000e+00> : vector<3x256xf32>
    %89 = tpu.matmul %88, %87, %cst_25 {dimension_numbers = #tpu.dot_dimension_numbers<[1], [0], [0], [1], [0, 0, 1, 1], [], []>} : vector<3x16xbf16>, vector<16x256xbf16>, vector<3x256xf32> -> vector<3x256xf32>
    %90 = arith.addf %83, %89 : vector<3x256xf32>
    %c16_i32_26 = arith.constant 16 : i32
    %91 = tpu.dynamic_rotate %80#0 by %c16_i32_26 dim 1 : vector<16x256xf32>, i32 -> vector<16x256xf32>
    %92 = vector.broadcast %2 : vector<1x256xf32> to vector<16x256xf32>
    %93 = arith.mulf %91, %92 : vector<16x256xf32>
    %94 = arith.truncf %93 : vector<16x256xf32> to vector<16x256xbf16>
    %95 = vector.extract_strided_slice %81 {offsets = [3, 0], sizes = [3, 16], strides = [1, 1]} : vector<27x16xbf16> to vector<3x16xbf16>
    %cst_27 = arith.constant dense<0.000000e+00> : vector<3x256xf32>
    %96 = tpu.matmul %95, %94, %cst_27 {dimension_numbers = #tpu.dot_dimension_numbers<[1], [0], [0], [1], [0, 0, 1, 1], [], []>} : vector<3x16xbf16>, vector<16x256xbf16>, vector<3x256xf32> -> vector<3x256xf32>
    %97 = arith.addf %90, %96 : vector<3x256xf32>
    %c15_i32_28 = arith.constant 15 : i32
    %98 = tpu.dynamic_rotate %80#0 by %c15_i32_28 dim 1 : vector<16x256xf32>, i32 -> vector<16x256xf32>
    %99 = vector.broadcast %3 : vector<1x256xf32> to vector<16x256xf32>
    %100 = arith.mulf %98, %99 : vector<16x256xf32>
    %101 = arith.truncf %100 : vector<16x256xf32> to vector<16x256xbf16>
    %102 = vector.extract_strided_slice %81 {offsets = [6, 0], sizes = [3, 16], strides = [1, 1]} : vector<27x16xbf16> to vector<3x16xbf16>
    %cst_29 = arith.constant dense<0.000000e+00> : vector<3x256xf32>
    %103 = tpu.matmul %102, %101, %cst_29 {dimension_numbers = #tpu.dot_dimension_numbers<[1], [0], [0], [1], [0, 0, 1, 1], [], []>} : vector<3x16xbf16>, vector<16x256xbf16>, vector<3x256xf32> -> vector<3x256xf32>
    %104 = arith.addf %97, %103 : vector<3x256xf32>
    %c1_i32_30 = arith.constant 1 : i32
    %105 = tpu.dynamic_rotate %80#0 by %c1_i32_30 dim 1 : vector<16x256xf32>, i32 -> vector<16x256xf32>
    %106 = vector.broadcast %4 : vector<1x256xf32> to vector<16x256xf32>
    %107 = arith.mulf %105, %106 : vector<16x256xf32>
    %108 = arith.truncf %107 : vector<16x256xf32> to vector<16x256xbf16>
    %109 = vector.extract_strided_slice %81 {offsets = [9, 0], sizes = [3, 16], strides = [1, 1]} : vector<27x16xbf16> to vector<3x16xbf16>
    %cst_31 = arith.constant dense<0.000000e+00> : vector<3x256xf32>
    %110 = tpu.matmul %109, %108, %cst_31 {dimension_numbers = #tpu.dot_dimension_numbers<[1], [0], [0], [1], [0, 0, 1, 1], [], []>} : vector<3x16xbf16>, vector<16x256xbf16>, vector<3x256xf32> -> vector<3x256xf32>
    %111 = arith.addf %104, %110 : vector<3x256xf32>
    %112 = vector.broadcast %5 : vector<1x256xf32> to vector<16x256xf32>
    %113 = arith.mulf %80#0, %112 : vector<16x256xf32>
    %114 = arith.truncf %113 : vector<16x256xf32> to vector<16x256xbf16>
    %115 = vector.extract_strided_slice %81 {offsets = [12, 0], sizes = [3, 16], strides = [1, 1]} : vector<27x16xbf16> to vector<3x16xbf16>
    %cst_32 = arith.constant dense<0.000000e+00> : vector<3x256xf32>
    %116 = tpu.matmul %115, %114, %cst_32 {dimension_numbers = #tpu.dot_dimension_numbers<[1], [0], [0], [1], [0, 0, 1, 1], [], []>} : vector<3x16xbf16>, vector<16x256xbf16>, vector<3x256xf32> -> vector<3x256xf32>
    %117 = arith.addf %111, %116 : vector<3x256xf32>
    %c255_i32_33 = arith.constant 255 : i32
    %118 = tpu.dynamic_rotate %80#0 by %c255_i32_33 dim 1 : vector<16x256xf32>, i32 -> vector<16x256xf32>
    %119 = vector.broadcast %6 : vector<1x256xf32> to vector<16x256xf32>
    %120 = arith.mulf %118, %119 : vector<16x256xf32>
    %121 = arith.truncf %120 : vector<16x256xf32> to vector<16x256xbf16>
    %122 = vector.extract_strided_slice %81 {offsets = [15, 0], sizes = [3, 16], strides = [1, 1]} : vector<27x16xbf16> to vector<3x16xbf16>
    %cst_34 = arith.constant dense<0.000000e+00> : vector<3x256xf32>
    %123 = tpu.matmul %122, %121, %cst_34 {dimension_numbers = #tpu.dot_dimension_numbers<[1], [0], [0], [1], [0, 0, 1, 1], [], []>} : vector<3x16xbf16>, vector<16x256xbf16>, vector<3x256xf32> -> vector<3x256xf32>
    %124 = arith.addf %117, %123 : vector<3x256xf32>
    %c241_i32_35 = arith.constant 241 : i32
    %125 = tpu.dynamic_rotate %80#0 by %c241_i32_35 dim 1 : vector<16x256xf32>, i32 -> vector<16x256xf32>
    %126 = vector.broadcast %7 : vector<1x256xf32> to vector<16x256xf32>
    %127 = arith.mulf %125, %126 : vector<16x256xf32>
    %128 = arith.truncf %127 : vector<16x256xf32> to vector<16x256xbf16>
    %129 = vector.extract_strided_slice %81 {offsets = [18, 0], sizes = [3, 16], strides = [1, 1]} : vector<27x16xbf16> to vector<3x16xbf16>
    %cst_36 = arith.constant dense<0.000000e+00> : vector<3x256xf32>
    %130 = tpu.matmul %129, %128, %cst_36 {dimension_numbers = #tpu.dot_dimension_numbers<[1], [0], [0], [1], [0, 0, 1, 1], [], []>} : vector<3x16xbf16>, vector<16x256xbf16>, vector<3x256xf32> -> vector<3x256xf32>
    %131 = arith.addf %124, %130 : vector<3x256xf32>
    %c240_i32_37 = arith.constant 240 : i32
    %132 = tpu.dynamic_rotate %80#0 by %c240_i32_37 dim 1 : vector<16x256xf32>, i32 -> vector<16x256xf32>
    %133 = vector.broadcast %8 : vector<1x256xf32> to vector<16x256xf32>
    %134 = arith.mulf %132, %133 : vector<16x256xf32>
    %135 = arith.truncf %134 : vector<16x256xf32> to vector<16x256xbf16>
    %136 = vector.extract_strided_slice %81 {offsets = [21, 0], sizes = [3, 16], strides = [1, 1]} : vector<27x16xbf16> to vector<3x16xbf16>
    %cst_38 = arith.constant dense<0.000000e+00> : vector<3x256xf32>
    %137 = tpu.matmul %136, %135, %cst_38 {dimension_numbers = #tpu.dot_dimension_numbers<[1], [0], [0], [1], [0, 0, 1, 1], [], []>} : vector<3x16xbf16>, vector<16x256xbf16>, vector<3x256xf32> -> vector<3x256xf32>
    %138 = arith.addf %131, %137 : vector<3x256xf32>
    %c239_i32_39 = arith.constant 239 : i32
    %139 = tpu.dynamic_rotate %80#0 by %c239_i32_39 dim 1 : vector<16x256xf32>, i32 -> vector<16x256xf32>
    %140 = vector.broadcast %9 : vector<1x256xf32> to vector<16x256xf32>
    %141 = arith.mulf %139, %140 : vector<16x256xf32>
    %142 = arith.truncf %141 : vector<16x256xf32> to vector<16x256xbf16>
    %143 = vector.extract_strided_slice %81 {offsets = [24, 0], sizes = [3, 16], strides = [1, 1]} : vector<27x16xbf16> to vector<3x16xbf16>
    %cst_40 = arith.constant dense<0.000000e+00> : vector<3x256xf32>
    %144 = tpu.matmul %143, %142, %cst_40 {dimension_numbers = #tpu.dot_dimension_numbers<[1], [0], [0], [1], [0, 0, 1, 1], [], []>} : vector<3x16xbf16>, vector<16x256xbf16>, vector<3x256xf32> -> vector<3x256xf32>
    %145 = arith.addf %138, %144 : vector<3x256xf32>
    %146 = vector.broadcast %82 : vector<3x1xf32> to vector<3x256xf32>
    %147 = arith.addf %145, %146 : vector<3x256xf32>
    %c0_41 = arith.constant 0 : index
    %c0_42 = arith.constant 0 : index
    %c0_43 = arith.constant 0 : index
    %148 = vector.load %arg9[%c0_41, %c0_42, %c0_43] : memref<1x3x256xf32, #tpu.memory_space<vmem>>, vector<1x3x256xf32>
    %149 = vector.shape_cast %148 : vector<1x3x256xf32> to vector<3x256xf32>
    %150 = vector.shape_cast %147 : vector<3x256xf32> to vector<1x3x256xf32>
    tpu.vector_store %arg9[%c0_41, %c0_42, %c0_43], %150 {strides = array<i32>} : memref<1x3x256xf32, #tpu.memory_space<vmem>>, vector<1x3x256xf32>,
    return
  }
  func.func @transform_0(%arg0: i32) -> (i32, i32, i32) {
    %c0_i32 = arith.constant 0 : i32
    %c0_i32_0 = arith.constant 0 : i32
    %c0_i32_1 = arith.constant 0 : i32
    return %arg0, %c0_i32, %c0_i32_0 : i32, i32, i32
  }
  func.func @transform_1(%arg0: i32) -> (i32, i32) {
    %c0_i32 = arith.constant 0 : i32
    %c0_i32_0 = arith.constant 0 : i32
    %c0_i32_1 = arith.constant 0 : i32
    return %c0_i32, %c0_i32_0 : i32, i32
  }
  func.func @transform_2(%arg0: i32) -> (i32, i32) {
    %c0_i32 = arith.constant 0 : i32
    %c0_i32_0 = arith.constant 0 : i32
    %c0_i32_1 = arith.constant 0 : i32
    return %c0_i32, %c0_i32_0 : i32, i32
  }
  func.func @transform_3(%arg0: i32) -> (i32, i32) {
    %c0_i32 = arith.constant 0 : i32
    %c0_i32_0 = arith.constant 0 : i32
    %c0_i32_1 = arith.constant 0 : i32
    return %c0_i32, %c0_i32_0 : i32, i32
  }
  func.func @transform_4(%arg0: i32) -> (i32, i32, i32) {
    %c0_i32 = arith.constant 0 : i32
    %c0_i32_0 = arith.constant 0 : i32
    %c0_i32_1 = arith.constant 0 : i32
    %c0_i32_2 = arith.constant 0 : i32
    return %c0_i32, %c0_i32_0, %c0_i32_1 : i32, i32, i32
  }
  func.func @transform_5(%arg0: i32) -> (i32, i32, i32) {
    %c0_i32 = arith.constant 0 : i32
    %c0_i32_0 = arith.constant 0 : i32
    %c0_i32_1 = arith.constant 0 : i32
    %c0_i32_2 = arith.constant 0 : i32
    return %c0_i32, %c0_i32_0, %c0_i32_1 : i32, i32, i32
  }
  func.func @transform_6(%arg0: i32) -> (i32, i32) {
    %c0_i32 = arith.constant 0 : i32
    %c0_i32_0 = arith.constant 0 : i32
    %c0_i32_1 = arith.constant 0 : i32
    return %c0_i32, %c0_i32_0 : i32, i32
  }
  func.func @transform_7(%arg0: i32) -> (i32, i32) {
    %c0_i32 = arith.constant 0 : i32
    %c0_i32_0 = arith.constant 0 : i32
    %c0_i32_1 = arith.constant 0 : i32
    return %c0_i32, %c0_i32_0 : i32, i32
  }
  func.func @transform_8(%arg0: i32) -> (i32, i32, i32) {
    %c0_i32 = arith.constant 0 : i32
    %c0_i32_0 = arith.constant 0 : i32
    %c0_i32_1 = arith.constant 0 : i32
    return %arg0, %c0_i32, %c0_i32_0 : i32, i32, i32
  }
}

</mosaic_0001>

<bundles_post_ra>
// kernel: denoising_network.1
= control target key start
LH: loop header
LB: loop body
LE: loop exit
PB: predicated region body
PF: predicated region fallthrough
CT: control target
= control target key end

     0   :  { %s3043_s27 = smov 0   ;;  %s3865_s0 = inlined_call_operand.vmem [shape: f32[2,3,256], index: 0, kind: input, shape index: {}]   ;;  %s3866_s1 = inlined_call_operand.vmem [shape: f32[9,256], index: 1, kind: input, shape index: {}]   ;;  %s3867_s2 = inlined_call_operand.vmem [shape: bf16[144,3], index: 2, kind: input, shape index: {}]   ;;  %s3868_s3 = inlined_call_operand.vmem [shape: f32[16,1], index: 3, kind: input, shape index: {}]   ;;  %s3869_s4 = inlined_call_operand.vmem [shape: bf16[24,144,16], index: 4, kind: input, shape index: {}]   ;;  %s3870_s5 = inlined_call_operand.vmem [shape: f32[24,16,1], index: 5, kind: input, shape index: {}]   ;;  %s3871_s6 = inlined_call_operand.vmem [shape: bf16[27,16], index: 6, kind: input, shape index: {}]   ;;  %s3872_s7 = inlined_call_operand.vmem [shape: f32[3,1], index: 7, kind: input, shape index: {}]   ;;  %s3873_s8 = inlined_call_operand.vmem [shape: f32[2,3,256], index: 8, kind: output, shape index: {}]  }
   0x1 LB: > { %s2563_s28 = sadd.s32 4294967295, %s2925_s27   ;;  %p2567_p0 = scmp.ge.s32.totalorder %s2925_s27, 1  ;;  %s2925_s27 = sphi %s3043_s27, %s18_s27  }
   0x2   : > { %p262_p1 = scmp.lt.s32.totalorder %s2925_s27, 3 }
   0x4   : > { %p263_p2 = pnand %p2567_p0, %p262_p1 }
   0x5   : > { %p296_p3 = scmp.lt.s32.totalorder (!%p263_p2), %s2563_s28, 1  ;;  %v339_v0 = vlaneseq (!%p263_p2)  ;;  %v2979_v2 = vmov (!%p263_p2), 0   ;;  %v3059_v3 = vld [vmem:[%s3866_s1] sm:$0xff] (!%p263_p2)  ;;  %v3064_v4 = vld [vmem:[%s3866_s1 + $0x8] sm:$0xff] (!%p263_p2)  ;;  %vm384_vm0 = vcmask (!%p263_p2), 1040384   ;;  %vm385_vm1 = vcmask (!%p263_p2), 1041408  }
   0x6   : > { %266 = sbr.rel (%p263_p2) target bundleno = 1219 (0x4c3), region = 52  ;;  %718 = vmatprep.mubr.bf16.mxu0 (!%p263_p2), %v2979_v2  ;;  %426 = vmatprep.mubr.bf16.mxu1 (!%p263_p2), %v2979_v2  ;;  %s2980_s18 = smov (!%p263_p2), 127   ;;  %v2982_v15 = vmov (!%p263_p2), 65535   ;;  %v2837_v38 = vld [vmem:[%s3867_s2 + $0x20] sm:$0xff] (!%p263_p2)   ;;  %vm380_vm2 = vcmask (!%p263_p2), 23552   ;;  %v331_v43 = vld [vmem:[%s3868_s3 + $0x8] sm:$0xff] (!%p263_p2) }
   0x7   : > { %v3052_v1 = vshrl.u32 (!%p263_p2), %v339_v0, 7  ;;  %2834 = vset.pattern.permute.xlu0 (!%p263_p2), %v2979_v2  ;;  %2835 = vset.pattern.permute.xlu1 (!%p263_p2), %v2979_v2  ;;  %s2981_s19 = smov (!%p263_p2), 16   ;;  %v386_v16 = vsel (!%p263_p2), %vm384_vm0, 4294967295, %v2982_v15  ;;  %s2983_s20 = smov (!%p263_p2), 17   ;;  %v330_v42 = vld [vmem:[%s3868_s3] sm:$0xff] (!%p263_p2)  ;;  %v3168_v44 = vand.u32 (!%p263_p2), 127, %v339_v0 }
   0x8   : > { %v3119_v28 = vsel (!%p263_p2), %vm385_vm1, %v386_v16, 0  ;;  %s2984_s21 = smov (!%p263_p2), 113   ;;  %s2985_s24 = smov (!%p263_p2), 15   ;;  %v2838_v16 = vld [vmem:[%s3867_s2 + $0x8] sm:$0xff] (!%p263_p2)  }
   0x9   : > { %v656_v5 = vsub.s32 (!%p263_p2), 4, %v3052_v1  ;;  %v742_v6 = vsub.s32 (!%p263_p2), 5, %v3052_v1  ;;  %v365_v7 = vsub.s32 (!%p263_p2), 1, %v3052_v1  ;;  %v346_v8 = vsub.s32 (!%p263_p2), 0, %v3052_v1  ;;  %s2986_s25 = smov (!%p263_p2), 112   ;;  %s2987_s26 = smov (!%p263_p2), 1  }
   0xa   : > { %v822_v22 = vsub.s32 (!%p263_p2), 6, %v3052_v1  ;;  %v503_v29 = vsub.s32 (!%p263_p2), 2, %v3052_v1  ;;  %v902_v33 = vsub.s32 (!%p263_p2), 7, %v3052_v1  ;;  %v583_v39 = vsub.s32 (!%p263_p2), 3, %v3052_v1  ;;  %s3314_s29 = smov (!%p263_p2), 0  }
   0xb   : > { %v3081_v10 = vrot.slane (!%p263_p2), %v3059_v3, %v656_v5  ;;  %v3084_v11 = vrot.slane (!%p263_p2), %v3064_v4, %v656_v5  ;;  %v3087_v12 = vrot.slane (!%p263_p2), %v3059_v3, %v742_v6  ;;  %v3090_v13 = vrot.slane (!%p263_p2), %v3064_v4, %v742_v6 }
   0xc   : > { %v3096_v17 = vrot.slane (!%p263_p2), %v3059_v3, %v365_v7  ;;  %v3099_v18 = vrot.slane (!%p263_p2), %v3059_v3, %v346_v8  ;;  %v3104_v20 = vrot.slane (!%p263_p2), %v3064_v4, %v346_v8  ;;  %v3107_v21 = vrot.slane (!%p263_p2), %v3064_v4, %v365_v7 }
   0xd   : > { %s3898_s28 = smov (!%p296_p3, %s2563_s28), 1  ;;  %v664_v19 = vcombine.low %v3081_v10, %v3084_v11  ;;  %v3111_v24 = vrot.slane %v3059_v3, %v822_v22  ;;  %v3114_v25 = vrot.slane %v3064_v4, %v822_v22  ;;  %v3125_v31 = vrot.slane %v3059_v3, %v503_v29 }
   0xe   : > { %s2634_s11 = sshll.u32 %s3898_s28, 3  ;;  %v3128_v32 = vrot.slane %v3064_v4, %v503_v29  ;;  %v3134_v36 = vrot.slane %v3059_v3, %v902_v33  ;;  %v3137_v37 = vrot.slane %v3064_v4, %v902_v33  ;;  %v3149_v40 = vrot.slane %v3059_v3, %v583_v39  ;;  %s2988_s28 = smov 111  }
   0xf   : > { %s300_s14 = scalar_lea.vmem %s3865_s0, %s2634_s11  ;;  %s3078_s17 = scalar_lea.vmem %s3873_s8, %s2634_s11  ;;  %v3152_v41 = vrot.slane %v3064_v4, %v583_v39  ;;  %vm737_vm3 = vcmp.lt.s32.totalorder %v3168_v44, 127  ;;  %vm360_vm4 = vcmp.lt.s32.totalorder %v3168_v44, 16  ;;  %vm341_vm5 = vcmp.lt.s32.totalorder %v3168_v44, 17 }
  0x10   : > { %v311_v9 = vld [vmem:[%s300_s14] sm:$0x77]  ;;  %vm817_vm6 = vcmp.lt.s32.totalorder %v3168_v44, 113  ;;  %vm498_vm7 = vcmp.lt.s32.totalorder %v3168_v44, 15  ;;  %vm897_vm8 = vcmp.lt.s32.totalorder %v3168_v44, 112  ;;  %vm578_vm9 = vcmp.lt.s32.totalorder %v3168_v44, 1 }
  0x11   : > { %733 = vrot.lane.b32.xlu1 %v311_v9, %s2980_s18  ;;  %356 = vrot.lane.b32.xlu0 %v311_v9, %s2981_s19  ;;  %v333_v14 = vcombine.high %v311_v9, %v311_v9  ;;  %v666_v23 = vmul.f32 %v664_v19, %v311_v9  ;;  %vm977_vm10 = vcmp.lt.s32.totalorder %v3168_v44, 111 }
  0x13   : > { %v668_v26 = vcombine.high %v666_v23, %v666_v23  ;;  %v670_v27 = vpack.c.bf16 %v666_v23, %v666_v23  ;;  %v2839_v23 = vld [vmem:[%s3867_s2 + $0x28] sm:$0xff]  }
  0x15   : > { %735 = vrot.lane.b32.xlu1 %v333_v14, %s2980_s18  ;;  %358 = vrot.lane.b32.xlu0 %v333_v14, %s2981_s19  ;;  %v671_v30 = vpack.c.bf16 %v668_v26, %v668_v26  ;;  %v681_v35 = vand.u32 %v670_v27, %v3119_v28 }
  0x17   : > { %v684_v34 = vand.u32 %v671_v30, %v3119_v28 }
  0x19   : > { %337 = vrot.lane.b32.xlu1 %v333_v14, %s2983_s20  ;;  %335 = vrot.lane.b32.xlu0 %v311_v9, %s2983_s20 }
  0x1a   : > { %686 = vmatprep.subr.bf16.mxu0 %v684_v34 }
  0x1b   : > { %687 = vmatpush1.bf16.msra.mxu0 %v681_v35 }
  0x1d   : > { %815 = vrot.lane.b32.xlu1 %v333_v14, %s2984_s21  ;;  %813 = vrot.lane.b32.xlu0 %v311_v9, %s2984_s21 }
  0x1e   : > { %2581 = vmatmul.mubr.msk.bf16.vlgmr.msra.gmra.mrb[0].mxu0 %vm380_vm2, %v2837_v38 }
  0x1f   : > { %798 = vmatprep.mubr.bf16.mxu0 %v2979_v2 }
  0x21   : > { %496 = vrot.lane.b32.xlu1 %v333_v14, %s2985_s24  ;;  %494 = vrot.lane.b32.xlu0 %v311_v9, %s2985_s24 }
  0x25   : > { %895 = vrot.lane.b32.xlu1 %v333_v14, %s2986_s25  ;;  %893 = vrot.lane.b32.xlu0 %v311_v9, %s2986_s25 }
  0x29   : > { %576 = vrot.lane.b32.xlu1 %v333_v14, %s2987_s26  ;;  %574 = vrot.lane.b32.xlu0 %v311_v9, %s2987_s26 }
  0x2d   : > { %975 = vrot.lane.b32.xlu1 %v333_v14, %s2988_s28  ;;  %973 = vrot.lane.b32.xlu0 %v311_v9, %s2988_s28 }
  0x31   : > { %1055 = vperm.xlu0 %2834, %v330_v42   ;;  %1060 = vperm.xlu1 %2835, %v331_v43  }
  0x83   : > { %v734_v45 = vpop.permute.xlu1 %733  ;;  %v357_v46 = vpop.permute.xlu0 %356 }
  0x87   : > { %v736_v47 = vpop.permute.xlu1 %735  ;;  %v359_v48 = vpop.permute.xlu0 %358 }
  0x88   : > { %v738_v49 = vsel %vm737_vm3, %v734_v45, %v736_v47  ;;  %v739_v50 = vsel %vm737_vm3, %v736_v47, %v734_v45  ;;  %v361_v51 = vsel %vm360_vm4, %v357_v46, %v359_v48  ;;  %v362_v52 = vsel %vm360_vm4, %v359_v48, %v357_v46 }
  0x89   : > { %v748_v53 = vmul.f32 %v3087_v12, %v738_v49  ;;  %v749_v54 = vmul.f32 %v3090_v13, %v739_v50  ;;  %v371_v55 = vmul.f32 %v3096_v17, %v362_v52  ;;  %v372_v56 = vmul.f32 %v3107_v21, %v361_v51 }
  0x8b   : > { %v750_v57 = vpack.c.bf16 %v748_v53, %v748_v53  ;;  %v751_v58 = vpack.c.bf16 %v749_v54, %v749_v54  ;;  %v373_v59 = vpack.c.bf16 %v371_v55, %v371_v55  ;;  %v338_v60 = vpop.permute.xlu1 %337  ;;  %v336_v61 = vpop.permute.xlu0 %335  ;;  %v374_v62 = vpack.c.bf16 %v372_v56, %v372_v56 }
  0x8c   : > { %v342_v63 = vsel %vm341_vm5, %v336_v61, %v338_v60  ;;  %v343_v0 = vsel %vm341_vm5, %v338_v60, %v336_v61 }
  0x8d   : > { %v761_v1 = vand.u32 %v750_v57, %v3119_v28  ;;  %v352_v3 = vmul.f32 %v3099_v18, %v343_v0  ;;  %v353_v4 = vmul.f32 %v3104_v20, %v342_v63  ;;  %v392_v5 = vand.u32 %v3119_v28, %v374_v62  ;;  %v2841_v63 = vld [vmem:[%s3867_s2 + $0x30] sm:$0xff]  }
  0x8e   : > { %v764_v6 = vand.u32 %v751_v58, %v3119_v28  ;;  %v389_v7 = vand.u32 %v3119_v28, %v373_v59  ;;  %v2840_v59 = vld [vmem:[%s3867_s2] sm:$0xff]  }
  0x8f   : > { %v354_v8 = vpack.c.bf16 %v352_v3, %v352_v3  ;;  %v355_v9 = vpack.c.bf16 %v353_v4, %v353_v4  ;;  %394 = vmatprep.subr.bf16.mxu1 %v392_v5  ;;  %v816_v14 = vpop.permute.xlu1 %815  ;;  %v814_v15 = vpop.permute.xlu0 %813 }
  0x90   : > { %766 = vmatprep.subr.bf16.mxu0 %v764_v6  ;;  %395 = vmatpush1.bf16.msra.mxu1 %v389_v7  ;;  %v818_v19 = vsel %vm817_vm6, %v814_v15, %v816_v14  ;;  %v819_v22 = vsel %vm817_vm6, %v816_v14, %v814_v15  ;;  %v3251_v7 = vld [vmem:[%s3866_s1 + $0x10] ss:$0 sm:$0xff] }
  0x91   : > { %v446_v26 = vand.u32 %v3119_v28, %v354_v8  ;;  %767 = vmatpush1.bf16.msra.mxu0 %v761_v1  ;;  %v828_v27 = vmul.f32 %v3111_v24, %v818_v19  ;;  %v829_v29 = vmul.f32 %v3114_v25, %v819_v22  ;;  %v449_v30 = vand.u32 %v3119_v28, %v355_v9  ;;  %v3256_v8 = vld [vmem:[%s3866_s1 + $0x18] ss:$0 sm:$0xff] }
  0x93   : > { %v830_v33 = vpack.c.bf16 %v828_v27, %v828_v27  ;;  %v831_v34 = vpack.c.bf16 %v829_v29, %v829_v29  ;;  %2573 = vmatmul.mubr.msk.bf16.vlgmr.msra.gmra.mrb[0].mxu1 %vm380_vm2, %v2838_v16  ;;  %451 = vmatprep.subr.bf16.mxu1 %v449_v30  ;;  %v497_v35 = vpop.permute.xlu1 %496  ;;  %v495_v38 = vpop.permute.xlu0 %494 }
  0x94   : > { %2583 = vmatmul.mubr.msk.bf16.vlgmr.msra.gmra.mrb[0].mxu0 %vm380_vm2, %v2839_v23  ;;  %452 = vmatpush1.bf16.msra.mxu1 %v446_v26  ;;  %v499_v39 = vsel %vm498_vm7, %v495_v38, %v497_v35  ;;  %v500_v42 = vsel %vm498_vm7, %v497_v35, %v495_v38  ;;  %v2843_v38 = vld [vmem:[%s3867_s2 + $0x38] sm:$0xff]  }
  0x95   : > { %v841_v43 = vand.u32 %v830_v33, %v3119_v28  ;;  %v844_v45 = vand.u32 %v831_v34, %v3119_v28  ;;  %v509_v46 = vmul.f32 %v3125_v31, %v500_v42  ;;  %v510_v47 = vmul.f32 %v3128_v32, %v499_v39  ;;  %878 = vmatprep.mubr.bf16.mxu0 %v2979_v2  ;;  %v2842_v34 = vld [vmem:[%s3867_s2 + $0x10] sm:$0xff]   ;;  %v2844_v42 = vld [vmem:[%s3867_s2 + $0x18] sm:$0xff]  }
  0x96   : > { %483 = vmatprep.mubr.bf16.mxu1 %v2979_v2 }
  0x97   : > { %846 = vmatprep.subr.bf16.mxu0 %v844_v45  ;;  %v512_v48 = vpack.c.bf16 %v510_v47, %v510_v47  ;;  %v896_v49 = vpop.permute.xlu1 %895  ;;  %v894_v50 = vpop.permute.xlu0 %893  ;;  %v511_v51 = vpack.c.bf16 %v509_v46, %v509_v46 }
  0x98   : > { %847 = vmatpush1.bf16.msra.mxu0 %v841_v43  ;;  %v898_v52 = vsel %vm897_vm8, %v894_v50, %v896_v49  ;;  %v899_v53 = vsel %vm897_vm8, %v896_v49, %v894_v50  ;;  %v2845_v43 = vld [vmem:[%s3867_s2 + $0x40] sm:$0xff]  }
  0x99   : > { %v908_v54 = vmul.f32 %v3134_v36, %v898_v52  ;;  %v909_v55 = vmul.f32 %v3137_v37, %v899_v53  ;;  %v525_v56 = vand.u32 %v512_v48, %v3119_v28  ;;  %v522_v62 = vand.u32 %v511_v51, %v3119_v28 }
  0x9b   : > { %v910_v57 = vpack.c.bf16 %v908_v54, %v908_v54  ;;  %v911_v58 = vpack.c.bf16 %v909_v55, %v909_v55  ;;  %527 = vmatprep.subr.bf16.mxu1 %v525_v56  ;;  %v577_v60 = vpop.permute.xlu1 %576  ;;  %v575_v61 = vpop.permute.xlu0 %574 }
  0x9c   : > { %v579_v0 = vsel %vm578_vm9, %v575_v61, %v577_v60  ;;  %v580_v1 = vsel %vm578_vm9, %v577_v60, %v575_v61 }
  0x9d   : > { %v921_v3 = vand.u32 %v910_v57, %v3119_v28  ;;  %v924_v4 = vand.u32 %v911_v58, %v3119_v28  ;;  %v589_v5 = vmul.f32 %v3149_v40, %v580_v1  ;;  %v590_v6 = vmul.f32 %v3152_v41, %v579_v0 }
  0x9f   : > { %2575 = vmatmul.mubr.msk.bf16.vlgmr.msra.gmra.mrb[0].mxu1 %vm380_vm2, %v2840_v59  ;;  %926 = vmatprep.subr.bf16.mxu0 %v924_v4  ;;  %v592_v9 = vpack.c.bf16 %v590_v6, %v590_v6  ;;  %v976_v14 = vpop.permute.xlu1 %975  ;;  %v974_v15 = vpop.permute.xlu0 %973  ;;  %v591_v29 = vpack.c.bf16 %v589_v5, %v589_v5 }
  0xa0   : > { %2585 = vmatmul.mubr.msk.bf16.vlgmr.msra.gmra.mrb[0].mxu0 %vm380_vm2, %v2841_v63  ;;  %528 = vmatpush1.bf16.msra.mxu1 %v522_v62  ;;  %v978_v16 = vsel %vm977_vm10, %v974_v15, %v976_v14  ;;  %v979_v19 = vsel %vm977_vm10, %v976_v14, %v974_v15 }
  0xa1   : > { %927 = vmatpush1.bf16.msra.mxu0 %v921_v3  ;;  %559 = vmatprep.mubr.bf16.mxu1 %v2979_v2  ;;  %v988_v22 = vmul.f32 %v3251_v7, %v978_v16  ;;  %v989_v23 = vmul.f32 %v3256_v8, %v979_v19  ;;  %v605_v26 = vand.u32 %v592_v9, %v3119_v28 }
  0xa2   : > { %958 = vmatprep.mubr.bf16.mxu0 %v2979_v2  ;;  %v602_v35 = vand.u32 %v591_v29, %v3119_v28 }
  0xa3   : > { %v991_v27 = vpack.c.bf16 %v989_v23, %v989_v23  ;;  %607 = vmatprep.subr.bf16.mxu1 %v605_v26  ;;  %v990_v30 = vpack.c.bf16 %v988_v22, %v988_v22 }
  0xa5   : > { %v1004_v33 = vand.u32 %v991_v27, %v3119_v28  ;;  %v1001_v39 = vand.u32 %v990_v30, %v3119_v28 }
  0xa7   : > { %1006 = vmatprep.subr.bf16.mxu0 %v1004_v33 }
  0xab   : > { %2577 = vmatmul.mubr.msk.bf16.vlgmr.msra.gmra.mrb[0].mxu1 %vm380_vm2, %v2842_v34 }
  0xac   : > { %2587 = vmatmul.mubr.msk.bf16.vlgmr.msra.gmra.mrb[0].mxu0 %vm380_vm2, %v2843_v38  ;;  %608 = vmatpush1.bf16.msra.mxu1 %v602_v35 }
  0xad   : > { %1007 = vmatpush1.bf16.msra.mxu0 %v1001_v39  ;;  %639 = vmatprep.mubr.bf16.mxu1 %v2979_v2 }
  0xae   : > { %1038 = vmatprep.mubr.bf16.mxu0 %v2979_v2 }
  0xb0   : > { %v1056_v28 = vpop.permute.xlu0 %1055  ;;  %v1061_v46 = vpop.permute.xlu1 %1060 }
  0xb7   : > { %2579 = vmatmul.mubr.msk.bf16.vlgmr.msra.gmra.mrb[0].mxu1 %vm380_vm2, %v2844_v42 }
  0xb8   : > { %2591 = vmatmul.mubr.msk.bf16.vlgmr.msra.gmra.mrb[0].mxu0 %vm380_vm2, %v2845_v43 }
 0x18a   : > { %v641_v45 = vpop.f32.mrb[0].mxu1 }
 0x18b   : > { %v1040_v47 = vpop.f32.mrb[0].mxu0  ;;  %v643_v48 = vpop.f32.mrb[1].mxu1 }
 0x18c   : > { %v2637_v49 = vadd.f32 %v1040_v47, %v641_v45  ;;  %v1042_v50 = vpop.f32.mrb[1].mxu0  ;;  %v645_v51 = vpop.f32.mrb[2].mxu1 }
 0x18d   : > { %v2638_v52 = vadd.f32 %v1042_v50, %v643_v48  ;;  %v1044_v53 = vpop.f32.mrb[2].mxu0  ;;  %v647_v54 = vpop.f32.mrb[3].mxu1 }
 0x18e   : > { %v2639_v55 = vadd.f32 %v1044_v53, %v645_v51  ;;  %v1063_v56 = vadd.f32 %v2637_v49, %v1056_v28   ;;  %v1046_v57 = vpop.f32.mrb[3].mxu0 }
 0x18f   : > { %v1064_v58 = vadd.f32 %v2638_v52, %v1056_v28   ;;  %v2640_v59 = vadd.f32 %v1046_v57, %v647_v54 }
 0x190   : > { %v1065_v60 = vadd.f32 %v2639_v55, %v1061_v46   ;;  %v3877_v1 = vmov %v1063_v56  ;;  %v3881_v6 = vmov %v1063_v56 }
 0x191   : > { %v1066_v61 = vadd.f32 %v2640_v59, %v1061_v46   ;;  %v3876_v0 = vmov %v1064_v58  ;;  %v3880_v5 = vmov %v1064_v58 }
 0x192   : > { %v3875_v63 = vmov %v1065_v60  ;;  %v3879_v4 = vmov %v1065_v60 }
 0x193   : > { %v3874_v62 = vmov %v1066_v61  ;;  %v3878_v3 = vmov %v1066_v61 }
 0x194 LB: >> { %s2989_s30 = smov 16   ;;  %v1438_v9 = vmul.f32 %v2969_v58, %v3084_v11  ;;  %v1440_v14 = vmul.f32 %v2961_v61, %v3084_v11  ;;  %v1437_v15 = vmul.f32 %v2973_v56, %v3081_v10  ;;  %v1439_v16 = vmul.f32 %v2965_v60, %v3081_v10  ;;  %s2636_s9 = smul.u32 72, %s2977_s29  ;;  %s2977_s29 = sphi %s3314_s29, %s1072_s29   ;;  %v2973_v56 = vphi %v1063_v56, %v3896_v56   ;;  %v2969_v58 = vphi %v1064_v58, %v3895_v58   ;;  %v2965_v60 = vphi %v1065_v60, %v3894_v60   ;;  %v2961_v61 = vphi %v1066_v61, %v3893_v61   ;;  %v2957_v6 = vphi %v3881_v6, %v1115_v6   ;;  %v2953_v5 = vphi %v3880_v5, %v1116_v5   ;;  %v2949_v4 = vphi %v3879_v4, %v1117_v4   ;;  %v2945_v3 = vphi %v3878_v3, %v1118_v3   ;;  %v2941_v1 = vphi %v3877_v1, %v1123_v1   ;;  %v2937_v0 = vphi %v3876_v0, %v1124_v0   ;;  %v2933_v63 = vphi %v3875_v63, %v1125_v63   ;;  %v2929_v62 = vphi %v3874_v62, %v1126_v62  }
 0x195   : >> { %1170 = vrot.lane.b32.xlu0 %v2973_v56, %s2989_s30  ;;  %1174 = vrot.lane.b32.xlu1 %v2969_v58, %s2989_s30  ;;  %v2990_v23 = vmov 0   ;;  %vm1193_vm11 = vcmask 130048   ;;  %s2991_s13 = smov 127   ;;  %s2992_s14 = smov 17  }
 0x196   : >> { %v1442_v19 = vpack.c.bf16 %v1440_v14, %v1438_v9  ;;  %v1441_v22 = vpack.c.bf16 %v1439_v16, %v1437_v15  ;;  %1483 = vmatprep.mubr.bf16.mxu0 %v2990_v23  ;;  %1229 = vmatprep.mubr.bf16.mxu1 %v2990_v23  ;;  %s3374_s12 = scalar_lea.vmem %s3869_s4, %s2636_s9  ;;  %s2993_s15 = smov 113  }
 0x197   : >> { %2846 = vset.pattern.permute.xlu0 %v2990_v23  ;;  %2847 = vset.pattern.permute.xlu1 %v2990_v23  ;;  %v2848_v26 = vld [vmem:[%s3374_s12 + $0x20] sm:$0xff]   ;;  %s2994_s16 = smov 15   ;;  %s2995_s22 = smov 112   ;;  %v2849_v52 = vld [vmem:[%s3374_s12 + $0x8] sm:$0xff]  }
 0x198   : >> { %1451 = vmatprep.subr.bf16.mxu0 %v1442_v19  ;;  %s2996_s23 = smov 1   ;;  %s2599_s9 = sshll.u32 %s2977_s29, 4 }
 0x199   : >> { %1172 = vrot.lane.b32.xlu0 %v2965_v60, %s2989_s30  ;;  %1176 = vrot.lane.b32.xlu1 %v2961_v61, %s2989_s30  ;;  %s2997_s30 = smov 111   ;;  %p1085_p4 = scmp.lt.s32.totalorder %s2977_s29, 0 }
 0x19a   : >> { %1452 = vmatpush1.bf16.msra.mxu0 %v1441_v22 }
 0x19d   : >> { %1498 = vrot.lane.b32.xlu0 %v2973_v56, %s2991_s13  ;;  %1500 = vrot.lane.b32.xlu1 %v2965_v60, %s2991_s13 }
 0x19e   : >> { %2609 = vmatmul.mubr.msk.bf16.vlgmr.msra.gmra.mrb[0].mxu0 %vm1193_vm11, %v2848_v26 }
 0x19f   : >> { %1556 = vmatprep.mubr.bf16.mxu0 %v2990_v23 }
 0x1a1   : >> { %1502 = vrot.lane.b32.xlu0 %v2969_v58, %s2991_s13  ;;  %1504 = vrot.lane.b32.xlu1 %v2961_v61, %s2991_s13  ;;  %s1149_s13 = scalar_lea.vmem %s3870_s5, %s2599_s9 }
 0x1a2   : >> { %v1150_v27 = vld [vmem:[%s1149_s13] sm:$0xff]  ;;  %v1151_v29 = vld [vmem:[%s1149_s13 + $0x8] sm:$0xff] }
 0x1a5   : >> { %1152 = vrot.lane.b32.xlu0 %v2973_v56, %s2992_s14  ;;  %1154 = vrot.lane.b32.xlu1 %v2965_v60, %s2992_s14 }
 0x1a9   : >> { %1156 = vrot.lane.b32.xlu0 %v2969_v58, %s2992_s14  ;;  %1158 = vrot.lane.b32.xlu1 %v2961_v61, %s2992_s14  ;;  %s1086_s14 = ssub.s32 0, %s2977_s29 }
 0x1ad   : >> { %1571 = vrot.lane.b32.xlu0 %v2973_v56, %s2993_s15  ;;  %1573 = vrot.lane.b32.xlu1 %v2965_v60, %s2993_s15 }
 0x1b1   : >> { %1575 = vrot.lane.b32.xlu0 %v2969_v58, %s2993_s15  ;;  %1577 = vrot.lane.b32.xlu1 %v2961_v61, %s2993_s15  ;;  %s2592_s15 = smin.u32 %s2977_s29, %s1086_s14  ;;  %s1072_s29 = sadd.s32 1, %s2977_s29  }
 0x1b2   : >> { %2857 = sdivrem.u32 %s2592_s15, 3  ;;  %p3612_p12 = scmp.ge.s32.totalorder %s1072_s29, 24  }
 0x1b3   : >> { %2859 = sdivrem.u32 %s2592_s15, 6 }
 0x1b5   : >> { %1291 = vrot.lane.b32.xlu0 %v2973_v56, %s2994_s16  ;;  %1293 = vrot.lane.b32.xlu1 %v2965_v60, %s2994_s16 }
 0x1b9   : >> { %1295 = vrot.lane.b32.xlu0 %v2969_v58, %s2994_s16  ;;  %1297 = vrot.lane.b32.xlu1 %v2961_v61, %s2994_s16 }
 0x1bb   : >> { %s2858_s16 = spop.drf %2857 }
 0x1bd   : >> { %1644 = vrot.lane.b32.xlu0 %v2973_v56, %s2995_s22  ;;  %1646 = vrot.lane.b32.xlu1 %v2965_v60, %s2995_s22 }
 0x1c1   : >> { %1648 = vrot.lane.b32.xlu0 %v2969_v58, %s2995_s22  ;;  %1650 = vrot.lane.b32.xlu1 %v2961_v61, %s2995_s22  ;;  %s1090_s22 = ssub.s32 0, %s2858_s16 }
 0x1c2   : >> { %s3900_s22 = smov (!%p1085_p4, %s1090_s22), %s2858_s16 }
 0x1c3   : >> { %p2594_p5 = scmp.lt.s32.totalorder %s3900_s22, 0  ;;  %s1096_s9 = sadd.s32 3, %s3900_s22 }
 0x1c5   : >> { %1364 = vrot.lane.b32.xlu0 %v2973_v56, %s2996_s23  ;;  %1366 = vrot.lane.b32.xlu1 %v2965_v60, %s2996_s23  ;;  %s3904_s9 = smov (!%p2594_p5, %s1096_s9), %s3900_s22 }
 0x1c6   : >> { %p1111_p7 = scmp.eq.s32.totalorder %s3904_s9, 0  ;;  %p1804_p8 = scmp.ne.s32.totalorder %s3904_s9, 2 }
 0x1c7   : >> { %p1816_p10 = scmp.eq.s32.totalorder %s3904_s9, 2 }
 0x1c8   : >> { %s1809_s11 = scalar_select %p1804_p8, 1, 0 }
 0x1c9   : >> { %1368 = vrot.lane.b32.xlu0 %v2969_v58, %s2996_s23  ;;  %1370 = vrot.lane.b32.xlu1 %v2961_v61, %s2996_s23  ;;  %s2860_s23 = spop.drf %2859 }
 0x1ca   : >> { %s1821_s14 = scalar_select %p1816_p10, 1, 0 }
 0x1cd   : >> { %1717 = vrot.lane.b32.xlu0 %v2973_v56, %s2997_s30  ;;  %1719 = vrot.lane.b32.xlu1 %v2965_v60, %s2997_s30 }
 0x1d1   : >> { %1721 = vrot.lane.b32.xlu0 %v2969_v58, %s2997_s30  ;;  %1723 = vrot.lane.b32.xlu1 %v2961_v61, %s2997_s30  ;;  %s1103_s30 = ssub.s32 0, %s2860_s23 }
 0x1d2   : >> { %s3902_s30 = smov (!%p1085_p4, %s1103_s30), %s2860_s23 }
 0x1d3   : >> { %p2597_p6 = scmp.lt.s32.totalorder %s3902_s30, 0  ;;  %s1109_s10 = sadd.s32 6, %s3902_s30 }
 0x1d5   : >> { %1792 = vperm.xlu0 %2846, %v1150_v27   ;;  %1797 = vperm.xlu1 %2847, %v1151_v29   ;;  %s3906_s10 = smov (!%p2597_p6, %s1109_s10), %s3902_s30 }
 0x1d6   : >> { %p1119_p9 = scmp.eq.s32.totalorder %s3906_s10, 0  ;;  %p1828_p11 = scmp.eq.s32.totalorder %s3906_s10, 5 }
 0x1d8   : >> { %s1120_s13 = scalar_select %p1119_p9, 1, 0 }
 0x1d9   : >> { %s1833_s15 = scalar_select %p1828_p11, 1, 0 }
 0x1da   : > { %2861 = vset.pattern.permute.xlu0 (%p3612_p12), %v2979_v2 }
 0x207   : >> { %v1171_v30 = vpop.permute.xlu0 %1170  ;;  %v1175_v33 = vpop.permute.xlu1 %1174 }
 0x208   : >> { %v1178_v34 = vsel %vm360_vm4, %v1171_v30, %v1175_v33  ;;  %v1180_v35 = vsel %vm360_vm4, %v1175_v33, %v1171_v30  ;;  %v2850_v30 = vld [vmem:[%s3374_s12 + $0x28] sm:$0xff]  }
 0x209   : >> { %v1182_v28 = vmul.f32 %v1180_v35, %v3096_v17  ;;  %v1183_v46 = vmul.f32 %v1178_v34, %v3107_v21 }
 0x20b   : >> { %v1173_v38 = vpop.permute.xlu0 %1172  ;;  %v1177_v39 = vpop.permute.xlu1 %1176 }
 0x20c   : >> { %v1179_v42 = vsel %vm360_vm4, %v1173_v38, %v1177_v39  ;;  %v1181_v43 = vsel %vm360_vm4, %v1177_v39, %v1173_v38 }
 0x20d   : >> { %v1184_v45 = vmul.f32 %v1181_v43, %v3096_v17  ;;  %v1185_v47 = vmul.f32 %v1179_v42, %v3107_v21 }
 0x20f   : >> { %v1499_v48 = vpop.permute.xlu0 %1498  ;;  %v1501_v49 = vpop.permute.xlu1 %1500  ;;  %v1187_v50 = vpack.c.bf16 %v1185_v47, %v1183_v46  ;;  %v1186_v51 = vpack.c.bf16 %v1184_v45, %v1182_v28 }
 0x211   : >> { %1197 = vmatprep.subr.bf16.mxu1 %v1187_v50 }
 0x212   : >> { %1198 = vmatpush1.bf16.msra.mxu1 %v1186_v51  ;;  %v2851_v51 = vld [vmem:[%s3374_s12] sm:$0xff]  }
 0x213   : >> { %v1503_v53 = vpop.permute.xlu0 %1502  ;;  %v1505_v54 = vpop.permute.xlu1 %1504 }
 0x214   : >> { %v1506_v55 = vsel %vm737_vm3, %v1499_v48, %v1503_v53  ;;  %v1508_v57 = vsel %vm737_vm3, %v1503_v53, %v1499_v48  ;;  %v1507_v59 = vsel %vm737_vm3, %v1501_v49, %v1505_v54  ;;  %v1509_v9 = vsel %vm737_vm3, %v1505_v54, %v1501_v49 }
 0x215   : >> { %v1510_v14 = vmul.f32 %v1506_v55, %v3087_v12  ;;  %v1511_v15 = vmul.f32 %v1508_v57, %v3090_v13  ;;  %v1512_v16 = vmul.f32 %v1507_v59, %v3087_v12  ;;  %v1513_v19 = vmul.f32 %v1509_v9, %v3090_v13  ;;  %2601 = vmatmul.mubr.msk.bf16.vlgmr.msra.gmra.mrb[0].mxu1 %vm1193_vm11, %v2849_v52 }
 0x216   : >> { %1280 = vmatprep.mubr.bf16.mxu1 %v2990_v23 }
 0x217   : >> { %v1514_v22 = vpack.c.bf16 %v1512_v16, %v1510_v14  ;;  %v1153_v26 = vpop.permute.xlu0 %1152  ;;  %v1155_v27 = vpop.permute.xlu1 %1154  ;;  %v1515_v29 = vpack.c.bf16 %v1513_v19, %v1511_v15 }
 0x219   : >> { %1524 = vmatprep.subr.bf16.mxu0 %v1515_v29  ;;  %v2852_v29 = vld [vmem:[%s3374_s12 + $0x30] sm:$0xff]  }
 0x21a   : >> { %1525 = vmatpush1.bf16.msra.mxu0 %v1514_v22 }
 0x21b   : >> { %v1157_v33 = vpop.permute.xlu0 %1156  ;;  %v1159_v34 = vpop.permute.xlu1 %1158 }
 0x21c   : >> { %v1160_v35 = vsel %vm341_vm5, %v1153_v26, %v1157_v33  ;;  %v1162_v38 = vsel %vm341_vm5, %v1157_v33, %v1153_v26  ;;  %v1161_v39 = vsel %vm341_vm5, %v1155_v27, %v1159_v34  ;;  %v1163_v42 = vsel %vm341_vm5, %v1159_v34, %v1155_v27 }
 0x21d   : >> { %v1164_v43 = vmul.f32 %v1162_v38, %v3099_v18  ;;  %v1165_v28 = vmul.f32 %v1160_v35, %v3104_v20  ;;  %v1166_v45 = vmul.f32 %v1163_v42, %v3099_v18  ;;  %v1167_v46 = vmul.f32 %v1161_v39, %v3104_v20  ;;  %2611 = vmatmul.mubr.msk.bf16.vlgmr.msra.gmra.mrb[0].mxu0 %vm1193_vm11, %v2850_v30 }
 0x21e   : >> { %1629 = vmatprep.mubr.bf16.mxu0 %v2990_v23 }
 0x21f   : >> { %v1168_v47 = vpack.c.bf16 %v1166_v45, %v1164_v43  ;;  %v1572_v48 = vpop.permute.xlu0 %1571  ;;  %v1574_v49 = vpop.permute.xlu1 %1573  ;;  %v1169_v50 = vpack.c.bf16 %v1167_v46, %v1165_v28 }
 0x221   : >> { %1248 = vmatprep.subr.bf16.mxu1 %v1169_v50  ;;  %v2853_v50 = vld [vmem:[%s3374_s12 + $0x10] sm:$0xff]  }
 0x222   : >> { %1249 = vmatpush1.bf16.msra.mxu1 %v1168_v47 }
 0x223   : >> { %v1576_v52 = vpop.permute.xlu0 %1575  ;;  %v1578_v53 = vpop.permute.xlu1 %1577 }
 0x224   : >> { %v1579_v54 = vsel %vm817_vm6, %v1572_v48, %v1576_v52  ;;  %v1581_v55 = vsel %vm817_vm6, %v1576_v52, %v1572_v48  ;;  %v1580_v57 = vsel %vm817_vm6, %v1574_v49, %v1578_v53  ;;  %v1582_v59 = vsel %vm817_vm6, %v1578_v53, %v1574_v49 }
 0x225   : >> { %v1583_v9 = vmul.f32 %v1579_v54, %v3111_v24  ;;  %v1584_v14 = vmul.f32 %v1581_v55, %v3114_v25  ;;  %v1585_v15 = vmul.f32 %v1580_v57, %v3111_v24  ;;  %v1586_v16 = vmul.f32 %v1582_v59, %v3114_v25  ;;  %2603 = vmatmul.mubr.msk.bf16.vlgmr.msra.gmra.mrb[0].mxu1 %vm1193_vm11, %v2851_v51 }
 0x226   : >> { %1349 = vmatprep.mubr.bf16.mxu1 %v2990_v23 }
 0x227   : >> { %v1587_v19 = vpack.c.bf16 %v1585_v15, %v1583_v9  ;;  %v1292_v22 = vpop.permute.xlu0 %1291  ;;  %v1294_v26 = vpop.permute.xlu1 %1293  ;;  %v1588_v27 = vpack.c.bf16 %v1586_v16, %v1584_v14 }
 0x229   : >> { %1597 = vmatprep.subr.bf16.mxu0 %v1588_v27  ;;  %v2854_v27 = vld [vmem:[%s3374_s12 + $0x38] sm:$0xff]  }
 0x22a   : >> { %1598 = vmatpush1.bf16.msra.mxu0 %v1587_v19 }
 0x22b   : >> { %v1296_v30 = vpop.permute.xlu0 %1295  ;;  %v1298_v33 = vpop.permute.xlu1 %1297 }
 0x22c   : >> { %v1299_v34 = vsel %vm498_vm7, %v1292_v22, %v1296_v30  ;;  %v1301_v35 = vsel %vm498_vm7, %v1296_v30, %v1292_v22  ;;  %v1300_v38 = vsel %vm498_vm7, %v1294_v26, %v1298_v33  ;;  %v1302_v39 = vsel %vm498_vm7, %v1298_v33, %v1294_v26 }
 0x22d   : >> { %v1303_v42 = vmul.f32 %v1301_v35, %v3125_v31  ;;  %v1304_v43 = vmul.f32 %v1299_v34, %v3128_v32  ;;  %v1305_v28 = vmul.f32 %v1302_v39, %v3125_v31  ;;  %v1306_v45 = vmul.f32 %v1300_v38, %v3128_v32  ;;  %2613 = vmatmul.mubr.msk.bf16.vlgmr.msra.gmra.mrb[0].mxu0 %vm1193_vm11, %v2852_v29 }
 0x22e   : >> { %1702 = vmatprep.mubr.bf16.mxu0 %v2990_v23 }
 0x22f   : >> { %v1307_v46 = vpack.c.bf16 %v1305_v28, %v1303_v42  ;;  %v1645_v47 = vpop.permute.xlu0 %1644  ;;  %v1647_v48 = vpop.permute.xlu1 %1646  ;;  %v1308_v49 = vpack.c.bf16 %v1306_v45, %v1304_v43 }
 0x231   : >> { %1317 = vmatprep.subr.bf16.mxu1 %v1308_v49  ;;  %v2855_v49 = vld [vmem:[%s3374_s12 + $0x18] sm:$0xff]  }
 0x232   : >> { %1318 = vmatpush1.bf16.msra.mxu1 %v1307_v46 }
 0x233   : >> { %v1649_v51 = vpop.permute.xlu0 %1648  ;;  %v1651_v52 = vpop.permute.xlu1 %1650 }
 0x234   : >> { %v1652_v53 = vsel %vm897_vm8, %v1645_v47, %v1649_v51  ;;  %v1654_v54 = vsel %vm897_vm8, %v1649_v51, %v1645_v47  ;;  %v1653_v55 = vsel %vm897_vm8, %v1647_v48, %v1651_v52  ;;  %v1655_v57 = vsel %vm897_vm8, %v1651_v52, %v1647_v48 }
 0x235   : >> { %v1656_v59 = vmul.f32 %v1652_v53, %v3134_v36  ;;  %v1657_v9 = vmul.f32 %v1654_v54, %v3137_v37  ;;  %v1658_v14 = vmul.f32 %v1653_v55, %v3134_v36  ;;  %v1659_v15 = vmul.f32 %v1655_v57, %v3137_v37  ;;  %2605 = vmatmul.mubr.msk.bf16.vlgmr.msra.gmra.mrb[0].mxu1 %vm1193_vm11, %v2853_v50 }
 0x236   : >> { %1422 = vmatprep.mubr.bf16.mxu1 %v2990_v23 }
 0x237   : >> { %v1660_v16 = vpack.c.bf16 %v1658_v14, %v1656_v59  ;;  %v1365_v19 = vpop.permute.xlu0 %1364  ;;  %v1367_v22 = vpop.permute.xlu1 %1366  ;;  %v1661_v26 = vpack.c.bf16 %v1659_v15, %v1657_v9 }
 0x239   : >> { %1670 = vmatprep.subr.bf16.mxu0 %v1661_v26 }
 0x23a   : >> { %1671 = vmatpush1.bf16.msra.mxu0 %v1660_v16  ;;  %v2856_v16 = vld [vmem:[%s3374_s12 + $0x40] sm:$0xff]   ;;  %s1112_s12 = scalar_select %p1111_p7, 1, 0 }
 0x23b   : >> { %v1369_v29 = vpop.permute.xlu0 %1368  ;;  %v1371_v30 = vpop.permute.xlu1 %1370 }
 0x23c   : >> { %v1372_v33 = vsel %vm578_vm9, %v1365_v19, %v1369_v29  ;;  %v1374_v34 = vsel %vm578_vm9, %v1369_v29, %v1365_v19  ;;  %v1373_v35 = vsel %vm578_vm9, %v1367_v22, %v1371_v30  ;;  %v1375_v38 = vsel %vm578_vm9, %v1371_v30, %v1367_v22 }
 0x23d   : >> { %v1376_v39 = vmul.f32 %v1374_v34, %v3149_v40  ;;  %v1377_v42 = vmul.f32 %v1372_v33, %v3152_v41  ;;  %v1378_v43 = vmul.f32 %v1375_v38, %v3149_v40  ;;  %v1379_v28 = vmul.f32 %v1373_v35, %v3152_v41  ;;  %2615 = vmatmul.mubr.msk.bf16.vlgmr.msra.gmra.mrb[0].mxu0 %vm1193_vm11, %v2854_v27 }
 0x23e   : >> { %1775 = vmatprep.mubr.bf16.mxu0 %v2990_v23  ;;  %v1113_v29 = vstv %s1112_s12  ;;  %v1810_v34 = vstv %s1809_s11 }
 0x23f   : >> { %v1380_v45 = vpack.c.bf16 %v1378_v43, %v1376_v39  ;;  %v1718_v46 = vpop.permute.xlu0 %1717  ;;  %v1720_v47 = vpop.permute.xlu1 %1719  ;;  %v1381_v48 = vpack.c.bf16 %v1379_v28, %v1377_v42  ;;  %vm3536_vm12 = vcmp.eq.s32.totalorder %v1113_v29, 1  ;;  %v1121_v43 = vstv %s1120_s13 }
 0x240   : >> { %v1115_v6 = vsel %vm3536_vm12, %v2973_v56, %v2957_v6   ;;  %vm3545_vm13 = vcmp.eq.s32.totalorder %v1810_v34, 1  ;;  %v1116_v5 = vsel %vm3536_vm12, %v2969_v58, %v2953_v5   ;;  %vm3553_vm14 = vcmp.eq.s32.totalorder %v1121_v43, 1 }
 0x241   : >> { %1390 = vmatprep.subr.bf16.mxu1 %v1381_v48  ;;  %v1117_v4 = vsel %vm3536_vm12, %v2965_v60, %v2949_v4   ;;  %v1118_v3 = vsel %vm3536_vm12, %v2961_v61, %v2945_v3   ;;  %v1123_v1 = vsel %vm3553_vm14, %v2973_v56, %v2941_v1   ;;  %v1124_v0 = vsel %vm3553_vm14, %v2969_v58, %v2937_v0  }
 0x242   : >> { %1391 = vmatpush1.bf16.msra.mxu1 %v1380_v45  ;;  %v1125_v63 = vsel %vm3553_vm14, %v2965_v60, %v2933_v63   ;;  %v1126_v62 = vsel %vm3553_vm14, %v2961_v61, %v2929_v62  }
 0x243   : >> { %v1722_v50 = vpop.permute.xlu0 %1721  ;;  %v1724_v51 = vpop.permute.xlu1 %1723 }
 0x244   : >> { %v1725_v52 = vsel %vm977_vm10, %v1718_v46, %v1722_v50  ;;  %v1727_v53 = vsel %vm977_vm10, %v1722_v50, %v1718_v46  ;;  %v1726_v23 = vsel %vm977_vm10, %v1720_v47, %v1724_v51  ;;  %v1728_v54 = vsel %vm977_vm10, %v1724_v51, %v1720_v47 }
 0x245   : >> { %v1729_v55 = vmul.f32 %v3251_v7, %v1725_v52  ;;  %v1730_v57 = vmul.f32 %v3256_v8, %v1727_v53  ;;  %v1731_v59 = vmul.f32 %v3251_v7, %v1726_v23  ;;  %v1732_v9 = vmul.f32 %v3256_v8, %v1728_v54  ;;  %2607 = vmatmul.mubr.msk.bf16.vlgmr.msra.gmra.mrb[0].mxu1 %vm1193_vm11, %v2855_v49 }
 0x246   : >> { %v1822_v50 = vstv %s1821_s14  ;;  %1972 = vmatprep.mubr.bf16.mxu1 (%p3612_p12), %v2979_v2 }
 0x247   : >> { %v1733_v14 = vpack.c.bf16 %v1731_v59, %v1729_v55  ;;  %v1734_v15 = vpack.c.bf16 %v1732_v9, %v1730_v57  ;;  %vm3567_vm15 = vcmp.eq.s32.totalorder %v1822_v50, 1 }
 0x249   : >> { %1743 = vmatprep.subr.bf16.mxu0 %v1734_v15 }
 0x24a   : >> { %1744 = vmatpush1.bf16.msra.mxu0 %v1733_v14 }
 0x24d   : >> { %2617 = vmatmul.mubr.msk.bf16.vlgmr.msra.gmra.mrb[0].mxu0 %vm1193_vm11, %v2856_v16 }
 0x24e   : > { %1928 = vmatprep.mubr.bf16.mxu0 (%p3612_p12), %v2979_v2 }
 0x254   : >> { %v1793_v35 = vpop.permute.xlu0 %1792  ;;  %v1798_v45 = vpop.permute.xlu1 %1797 }
 0x318   : >> { %v1424_v19 = vpop.f32.mrb[0].mxu1 }
 0x319   : >> { %v1426_v22 = vpop.f32.mrb[1].mxu1 }
 0x31a   : >> { %v1428_v26 = vpop.f32.mrb[2].mxu1 }
 0x31b   : >> { %v1430_v27 = vpop.f32.mrb[3].mxu1 }
 0x320   : >> { %v1777_v33 = vpop.f32.mrb[0].mxu0 }
 0x321   : >> { %v2669_v38 = vadd.f32 %v1777_v33, %v1424_v19  ;;  %v1779_v39 = vpop.f32.mrb[1].mxu0 }
 0x322   : >> { %v2670_v42 = vadd.f32 %v1779_v39, %v1426_v22  ;;  %v1781_v28 = vpop.f32.mrb[2].mxu0  ;;  %v1834_v22 = vstv %s1833_s15 }
 0x323   : >> { %v1800_v47 = vadd.f32 %v2669_v38, %v1793_v35  ;;  %v2671_v48 = vadd.f32 %v1781_v28, %v1428_v26  ;;  %v1783_v49 = vpop.f32.mrb[3].mxu0  ;;  %vm1835_vm0 = vcmp.eq.s32.totalorder %v1834_v22, 1 }
 0x324   : >> { %v1801_v51 = vadd.f32 %v2670_v42, %v1793_v35  ;;  %v2672_v52 = vadd.f32 %v1783_v49, %v1430_v27 }
 0x325   : >> { %v1805_v23 = vmax.f32 %v1800_v47, 0.0  ;;  %v1802_v54 = vadd.f32 %v2671_v48, %v1798_v45 }
 0x326   : >> { %v1806_v55 = vmax.f32 %v1801_v51, 0.0  ;;  %v1803_v57 = vadd.f32 %v2672_v52, %v1798_v45 }
 0x327   : >> { %v1812_v9 = vsel %vm3545_vm13, %v1805_v23, %v1800_v47  ;;  %v1807_v14 = vmax.f32 %v1802_v54, 0.0 }
 0x328   : >> { %v1813_v15 = vsel %vm3545_vm13, %v1806_v55, %v1801_v51  ;;  %v1817_v16 = vadd.f32 %v1812_v9, %v1115_v6  ;;  %v1808_v19 = vmax.f32 %v1803_v57, 0.0 }
 0x329   : >> { %v1818_v26 = vadd.f32 %v1813_v15, %v1116_v5  ;;  %v1814_v27 = vsel %vm3545_vm13, %v1807_v14, %v1802_v54 }
 0x32a   : >> { %v1824_v29 = vsel %vm3567_vm15, %v1817_v16, %v1812_v9  ;;  %v1815_v56 = vsel %vm3545_vm13, %v1808_v19, %v1803_v57  ;;  %v1819_v30 = vadd.f32 %v1814_v27, %v1117_v4 }
 0x32b   : >> { %v1825_v33 = vsel %vm3567_vm15, %v1818_v26, %v1813_v15  ;;  %v1829_v34 = vadd.f32 %v1824_v29, %v1123_v1  ;;  %v1820_v35 = vadd.f32 %v1815_v56, %v1118_v3 }
 0x32c   : >> { %v1830_v38 = vadd.f32 %v1825_v33, %v1124_v0  ;;  %v1826_v58 = vsel %vm3567_vm15, %v1819_v30, %v1814_v27  ;;  %1071 = sbr.rel (!%p3612_p12) target bundleno = 404 (0x194), region = 91 }
 0x32d   : >> { %v3597_v39 = vsel %vm1835_vm0, %v1829_v34, %v1824_v29   ;;  %v1827_v42 = vsel %vm3567_vm15, %v1820_v35, %v1815_v56  ;;  %v1831_v43 = vadd.f32 %v1826_v58, %v1125_v63 }
 0x32e   : >> { %v3605_v28 = vsel %vm1835_vm0, %v1830_v38, %v1825_v33   ;;  %v1832_v45 = vadd.f32 %v1827_v42, %v1126_v62  ;;  %v3896_v56 = vmov %v3597_v39  ;;  %1863 = vrot.lane.b32.xlu0 (%p3612_p12), %v3597_v39, %s2981_s19 }
 0x32f   : >> { %v3607_v60 = vsel %vm1835_vm0, %v1831_v43, %v1826_v58   ;;  %v3895_v58 = vmov %v3605_v28  ;;  %1867 = vrot.lane.b32.xlu1 (%p3612_p12), %v3605_v28, %s2981_s19 }
 0x330   : >> { %v3890_v46 = vmov %v3607_v60  ;;  %v3609_v61 = vsel %vm1835_vm0, %v1832_v45, %v1827_v42   ;;  %v1841_v58 = vld [vmem:[%s3871_s6 + $0x4] sm:$0xf] (%p3612_p12) }
 0x331   : >> { %v3891_v47 = vmov %v3609_v61  ;;  %v3894_v60 = vmov %v3890_v46  ;;  %v3755_v45 = vcombine.low (%p3612_p12), %v1841_v58, %v1841_v58 }
 0x332   : >> { %v3893_v61 = vmov %v3891_v47  ;;  %1865 = vrot.lane.b32.xlu0 (%p3612_p12), %v3890_v46, %s2981_s19  ;;  %v1844_v60 = vld [vmem:[%s3872_s7] sm:$0x7] (%p3612_p12) }
 0x333   : > { %1869 = vrot.lane.b32.xlu1 %v3891_v47, %s2981_s19  ;;  %v3721_v61 = vld [vmem:[%s3871_s6] sm:$0xf] }
 0x334   : > { %v2618_v62 = vcombine.low %v3721_v61, %v3721_v61  ;;  %v2621_v43 = vcombine.low %v3721_v61, %v1841_v58 }
 0x336   : > { %1845 = vrot.lane.b32.xlu0 %v3597_v39, %s2983_s20  ;;  %v1885_v1 = vshrl.u32 %v2618_v62, 16  ;;  %v1888_v3 = vshll.u32 %v2618_v62, 16 }
 0x337   : > { %1847 = vrot.lane.b32.xlu1 %v3890_v46, %s2983_s20 }
 0x338   : > { %v1887_v51 = vrot.slane %v1885_v1, 1  ;;  %v1890_v52 = vrot.slane %v1888_v3, 2 }
 0x33a   : > { %1849 = vrot.lane.b32.xlu0 %v3605_v28, %s2983_s20  ;;  %v1891_v15 = vor.u32 %v1890_v52, %v1887_v51  ;;  %v2071_v51 = vshll.u32 %v3755_v45, 16 }
 0x33b   : > { %1851 = vrot.lane.b32.xlu1 %v3891_v47, %s2983_s20 }
 0x33e   : > { %1981 = vrot.lane.b32.xlu0 %v3597_v39, %s2985_s24 }
 0x33f   : > { %1983 = vrot.lane.b32.xlu1 %v3890_v46, %s2985_s24 }
 0x342   : > { %1985 = vrot.lane.b32.xlu0 %v3605_v28, %s2985_s24 }
 0x343   : > { %1987 = vrot.lane.b32.xlu1 %v3891_v47, %s2985_s24 }
 0x346   : > { %2049 = vrot.lane.b32.xlu0 %v3597_v39, %s2987_s26 }
 0x347   : > { %2051 = vrot.lane.b32.xlu1 %v3890_v46, %s2987_s26 }
 0x34a   : > { %2053 = vrot.lane.b32.xlu0 %v3605_v28, %s2987_s26 }
 0x34b   : > { %2055 = vrot.lane.b32.xlu1 %v3891_v47, %s2987_s26 }
 0x34e   : > { %2174 = vrot.lane.b32.xlu0 %v3597_v39, %s2980_s18 }
 0x34f   : > { %2176 = vrot.lane.b32.xlu1 %v3890_v46, %s2980_s18 }
 0x352   : > { %2178 = vrot.lane.b32.xlu0 %v3605_v28, %s2980_s18 }
 0x353   : > { %2180 = vrot.lane.b32.xlu1 %v3891_v47, %s2980_s18 }
 0x356   : > { %2249 = vrot.lane.b32.xlu0 %v3597_v39, %s2984_s21 }
 0x357   : > { %2251 = vrot.lane.b32.xlu1 %v3890_v46, %s2984_s21 }
 0x35a   : > { %2253 = vrot.lane.b32.xlu0 %v3605_v28, %s2984_s21 }
 0x35b   : > { %2255 = vrot.lane.b32.xlu1 %v3891_v47, %s2984_s21 }
 0x35e   : > { %2315 = vrot.lane.b32.xlu0 %v3597_v39, %s2986_s25 }
 0x35f   : > { %2317 = vrot.lane.b32.xlu1 %v3890_v46, %s2986_s25 }
 0x362   : > { %2319 = vrot.lane.b32.xlu0 %v3605_v28, %s2986_s25 }
 0x363   : > { %2321 = vrot.lane.b32.xlu1 %v3891_v47, %s2986_s25 }
 0x366   : > { %2387 = vrot.lane.b32.xlu0 %v3597_v39, %s2988_s28 }
 0x367   : > { %2389 = vrot.lane.b32.xlu1 %v3890_v46, %s2988_s28 }
 0x36a   : > { %2391 = vrot.lane.b32.xlu0 %v3605_v28, %s2988_s28 }
 0x36b   : > { %2393 = vrot.lane.b32.xlu1 %v3891_v47, %s2988_s28 }
 0x36e   : > { %2453 = vperm.xlu0 %2861, %v1844_v60   ;;  %v2124_v60 = vmul.f32 %v3891_v47, %v3084_v11  ;;  %v2121_v47 = vmul.f32 %v3597_v39, %v3081_v10 }
 0x3a0   : > { %v1864_v0 = vpop.permute.xlu0 %1863 }
 0x3a1   : > { %v1868_v63 = vpop.permute.xlu1 %1867 }
 0x3a2   : > { %v1871_v4 = vsel %vm360_vm4, %v1864_v0, %v1868_v63  ;;  %v1873_v5 = vsel %vm360_vm4, %v1868_v63, %v1864_v0 }
 0x3a3   : > { %v1875_v53 = vmul.f32 %v1873_v5, %v3096_v17  ;;  %v1876_v54 = vmul.f32 %v1871_v4, %v3107_v21  ;;  %v2123_v5 = vmul.f32 %v3890_v46, %v3081_v10  ;;  %v2073_v10 = vrot.slane %v2071_v51, 1 }
 0x3a4   : > { %v1866_v48 = vpop.permute.xlu0 %1865 }
 0x3a5   : > { %v1870_v6 = vpop.permute.xlu1 %1869  ;;  %v2125_v52 = vpack.c.bf16 %v2123_v5, %v2121_v47 }
 0x3a6   : > { %v1872_v49 = vsel %vm360_vm4, %v1866_v48, %v1870_v6  ;;  %v1874_v50 = vsel %vm360_vm4, %v1870_v6, %v1866_v48 }
 0x3a7   : > { %v1877_v23 = vmul.f32 %v1874_v50, %v3096_v17  ;;  %v1878_v55 = vmul.f32 %v1872_v49, %v3107_v21 }
 0x3a8   : > { %v1846_v59 = vpop.permute.xlu0 %1845 }
 0x3a9   : > { %v1848_v57 = vpop.permute.xlu1 %1847  ;;  %v1880_v9 = vpack.c.bf16 %v1878_v55, %v1876_v54  ;;  %v1879_v14 = vpack.c.bf16 %v1877_v23, %v1875_v53  ;;  %v2069_v23 = vshrl.u32 %v3755_v45, 16 }
 0x3ab   : > { %1896 = vmatprep.subr.bf16.mxu0 %v1880_v9 }
 0x3ac   : > { %1897 = vmatpush1.bf16.msra.mxu0 %v1879_v14  ;;  %v1850_v19 = vpop.permute.xlu0 %1849 }
 0x3ad   : > { %v1852_v16 = vpop.permute.xlu1 %1851  ;;  %v1853_v17 = vsel %vm341_vm5, %v1846_v59, %v1850_v19  ;;  %v1855_v21 = vsel %vm341_vm5, %v1850_v19, %v1846_v59 }
 0x3ae   : > { %v1854_v22 = vsel %vm341_vm5, %v1848_v57, %v1852_v16  ;;  %v1856_v26 = vsel %vm341_vm5, %v1852_v16, %v1848_v57  ;;  %v1857_v29 = vmul.f32 %v1855_v21, %v3099_v18  ;;  %v1858_v56 = vmul.f32 %v1853_v17, %v3104_v20 }
 0x3af   : > { %v1859_v27 = vmul.f32 %v1856_v26, %v3099_v18  ;;  %v1860_v30 = vmul.f32 %v1854_v22, %v3104_v20  ;;  %2619 = vmatmul.mubr.msk.bf16.vlgmr.msra.gmra.mrb[0].mxu0 %vm1193_vm11, %v1891_v15  ;;  %v2122_v20 = vmul.f32 %v3605_v28, %v3084_v11 }
 0x3b0   : > { %2038 = vmatprep.mubr.bf16.mxu0 %v2979_v2  ;;  %v1982_v34 = vpop.permute.xlu0 %1981 }
 0x3b1   : > { %v1984_v33 = vpop.permute.xlu1 %1983  ;;  %v1862_v35 = vpack.c.bf16 %v1860_v30, %v1858_v56  ;;  %v1861_v38 = vpack.c.bf16 %v1859_v27, %v1857_v29  ;;  %v2074_v29 = vor.u32 %v2073_v10, %v2069_v23  ;;  %v2127_v56 = vrot.slane %v3755_v45, 2 }
 0x3b3   : > { %1940 = vmatprep.subr.bf16.mxu1 %v1862_v35 }
 0x3b4   : > { %1941 = vmatpush1.bf16.msra.mxu1 %v1861_v38  ;;  %v1986_v18 = vpop.permute.xlu0 %1985 }
 0x3b5   : > { %v1988_v42 = vpop.permute.xlu1 %1987  ;;  %v1989_v0 = vsel %vm498_vm7, %v1982_v34, %v1986_v18  ;;  %v1991_v1 = vsel %vm498_vm7, %v1986_v18, %v1982_v34 }
 0x3b6   : > { %v1990_v62 = vsel %vm498_vm7, %v1984_v33, %v1988_v42  ;;  %v1992_v63 = vsel %vm498_vm7, %v1988_v42, %v1984_v33  ;;  %v1993_v28 = vmul.f32 %v1991_v1, %v3125_v31  ;;  %v1994_v11 = vmul.f32 %v1989_v0, %v3128_v32 }
 0x3b7   : > { %v1995_v3 = vmul.f32 %v1992_v63, %v3125_v31  ;;  %v1996_v4 = vmul.f32 %v1990_v62, %v3128_v32  ;;  %2620 = vmatmul.mubr.msk.bf16.vlgmr.msra.gmra.mrb[0].mxu1 %vm1193_vm11, %v3721_v61  ;;  %v2126_v31 = vpack.c.bf16 %v2124_v60, %v2122_v20  ;;  %v1842_v32 = vld [vmem:[%s3871_s6 + $0x8] sm:$0xf]  ;;  %v2002_v61 = vrot.slane %v2621_v43, 3 }
 0x3b8   : > { %2110 = vmatprep.mubr.bf16.mxu1 %v2979_v2  ;;  %v2050_v49 = vpop.permute.xlu0 %2049  ;;  %v2626_v46 = vcombine.low %v1841_v58, %v1842_v32 }
 0x3b9   : > { %v1997_v6 = vpack.c.bf16 %v1995_v3, %v1993_v28  ;;  %v2052_v48 = vpop.permute.xlu1 %2051  ;;  %v1998_v50 = vpack.c.bf16 %v1996_v4, %v1994_v11 }
 0x3ba   : > { %v2196_v21 = vshrl.u32 %v2626_v46, 16  ;;  %v2199_v27 = vshll.u32 %v2626_v46, 16 }
 0x3bb   : > { %2006 = vmatprep.subr.bf16.mxu0 %v1998_v50 }
 0x3bc   : > { %2007 = vmatpush1.bf16.msra.mxu0 %v1997_v6  ;;  %v2054_v39 = vpop.permute.xlu0 %2053  ;;  %v2198_v33 = vrot.slane %v2196_v21, 3 }
 0x3bd   : > { %v2056_v53 = vpop.permute.xlu1 %2055  ;;  %2131 = vmatprep.subr.bf16.mxu0 %v2126_v31  ;;  %v2057_v57 = vsel %vm578_vm9, %v2050_v49, %v2054_v39  ;;  %v2059_v59 = vsel %vm578_vm9, %v2054_v39, %v2050_v49 }
 0x3be   : > { %v2058_v54 = vsel %vm578_vm9, %v2052_v48, %v2056_v53  ;;  %v2060_v55 = vsel %vm578_vm9, %v2056_v53, %v2052_v48  ;;  %v2061_v15 = vmul.f32 %v2059_v59, %v3149_v40  ;;  %v2062_v16 = vmul.f32 %v2057_v57, %v3152_v41 }
 0x3bf   : > { %v2063_v9 = vmul.f32 %v2060_v55, %v3149_v40  ;;  %v2064_v14 = vmul.f32 %v2058_v54, %v3152_v41  ;;  %2622 = vmatmul.mubr.msk.bf16.vlgmr.msra.gmra.mrb[4].mxu0 %vm1193_vm11, %v2002_v61  ;;  %v2201_v41 = vrot.slane %v2199_v27, 4 }
 0x3c0   : > { %2132 = vmatpush1.bf16.msra.mxu0 %v2125_v52  ;;  %2163 = vmatprep.mubr.bf16.mxu0 %v2979_v2  ;;  %v2175_v26 = vpop.permute.xlu0 %2174 }
 0x3c1   : > { %v2065_v19 = vpack.c.bf16 %v2063_v9, %v2061_v15  ;;  %v2177_v22 = vpop.permute.xlu1 %2176  ;;  %v2066_v17 = vpack.c.bf16 %v2064_v14, %v2062_v16  ;;  %v2202_v0 = vor.u32 %v2201_v41, %v2198_v33  ;;  %v1843_v41 = vld [vmem:[%s3871_s6 + $0xc] sm:$0x3] }
 0x3c3   : > { %2078 = vmatprep.subr.bf16.mxu1 %v2066_v17 }
 0x3c4   : > { %2079 = vmatpush1.bf16.msra.mxu1 %v2065_v19  ;;  %v2179_v40 = vpop.permute.xlu0 %2178 }
 0x3c5   : > { %v2181_v30 = vpop.permute.xlu1 %2180  ;;  %v2182_v38 = vsel %vm737_vm3, %v2175_v26, %v2179_v40  ;;  %v2184_v58 = vsel %vm737_vm3, %v2179_v40, %v2175_v26 }
 0x3c6   : > { %v2183_v34 = vsel %vm737_vm3, %v2177_v22, %v2181_v30  ;;  %v2185_v35 = vsel %vm737_vm3, %v2181_v30, %v2177_v22  ;;  %v2186_v43 = vmul.f32 %v2182_v38, %v3087_v12  ;;  %v2187_v45 = vmul.f32 %v2184_v58, %v3090_v13 }
 0x3c7   : > { %v2188_v42 = vmul.f32 %v2183_v34, %v3087_v12  ;;  %v2189_v18 = vmul.f32 %v2185_v35, %v3090_v13  ;;  %2624 = vmatmul.mubr.msk.bf16.vlgmr.msra.gmra.mrb[4].mxu1 %vm1193_vm11, %v2074_v29  ;;  %2625 = vmatmul.mubr.msk.bf16.vlgmr.msra.gmra.mrb[8].mxu0 %vm1193_vm11, %v2127_v56  ;;  %v2628_v12 = vcombine.low %v1842_v32, %v1842_v32 }
 0x3c8   : > { %2238 = vmatprep.mubr.bf16.mxu1 %v2979_v2  ;;  %v2250_v62 = vpop.permute.xlu0 %2249  ;;  %2304 = vmatprep.mubr.bf16.mxu0 %v2979_v2 }
 0x3c9   : > { %v2190_v20 = vpack.c.bf16 %v2188_v42, %v2186_v43  ;;  %v2252_v60 = vpop.permute.xlu1 %2251  ;;  %v2191_v63 = vpack.c.bf16 %v2189_v18, %v2187_v45  ;;  %v2334_v32 = vshrl.u32 %v2628_v12, 16  ;;  %v2337_v61 = vshll.u32 %v2628_v12, 16 }
 0x3ca   : > { %v2268_v52 = vrot.slane %v2628_v12, 1 }
 0x3cb   : > { %2206 = vmatprep.subr.bf16.mxu1 %v2191_v63  ;;  %v2336_v23 = vrot.slane %v2334_v32, 2  ;;  %v2339_v10 = vrot.slane %v2337_v61, 3 }
 0x3cc   : > { %2207 = vmatpush1.bf16.msra.mxu1 %v2190_v20  ;;  %v2254_v3 = vpop.permute.xlu0 %2253 }
 0x3cd   : > { %v2256_v1 = vpop.permute.xlu1 %2255  ;;  %v2257_v28 = vsel %vm817_vm6, %v2250_v62, %v2254_v3  ;;  %v2259_v11 = vsel %vm817_vm6, %v2254_v3, %v2250_v62  ;;  %v2340_v22 = vor.u32 %v2339_v10, %v2336_v23 }
 0x3ce   : > { %v2258_v13 = vsel %vm817_vm6, %v2252_v60, %v2256_v1  ;;  %v2260_v4 = vsel %vm817_vm6, %v2256_v1, %v2252_v60  ;;  %v2261_v6 = vmul.f32 %v2257_v28, %v3111_v24  ;;  %v2262_v48 = vmul.f32 %v2259_v11, %v3114_v25 }
 0x3cf   : > { %v2263_v47 = vmul.f32 %v2258_v13, %v3111_v24  ;;  %v2264_v5 = vmul.f32 %v2260_v4, %v3114_v25  ;;  %2627 = vmatmul.mubr.msk.bf16.vlgmr.msra.gmra.mrb[8].mxu1 %vm1193_vm11, %v2202_v0 }
 0x3d0   : > { %2376 = vmatprep.mubr.bf16.mxu1 %v2979_v2  ;;  %v2316_v51 = vpop.permute.xlu0 %2315 }
 0x3d1   : > { %v2265_v49 = vpack.c.bf16 %v2263_v47, %v2261_v6  ;;  %v2318_v50 = vpop.permute.xlu1 %2317  ;;  %v2266_v31 = vpack.c.bf16 %v2264_v5, %v2262_v48 }
 0x3d3   : > { %2272 = vmatprep.subr.bf16.mxu0 %v2266_v31 }
 0x3d4   : > { %2273 = vmatpush1.bf16.msra.mxu0 %v2265_v49  ;;  %v2320_v39 = vpop.permute.xlu0 %2319 }
 0x3d5   : > { %v2322_v53 = vpop.permute.xlu1 %2321  ;;  %v2323_v46 = vsel %vm897_vm8, %v2316_v51, %v2320_v39  ;;  %v2325_v54 = vsel %vm897_vm8, %v2320_v39, %v2316_v51 }
 0x3d6   : > { %v2324_v24 = vsel %vm897_vm8, %v2318_v50, %v2322_v53  ;;  %v2326_v25 = vsel %vm897_vm8, %v2322_v53, %v2318_v50  ;;  %v2327_v59 = vmul.f32 %v2323_v46, %v3134_v36  ;;  %v2328_v9 = vmul.f32 %v2325_v54, %v3137_v37 }
 0x3d7   : > { %v2329_v55 = vmul.f32 %v2324_v24, %v3134_v36  ;;  %v2330_v57 = vmul.f32 %v2326_v25, %v3137_v37  ;;  %2629 = vmatmul.mubr.msk.bf16.vlgmr.msra.gmra.mrb[12].mxu0 %vm1193_vm11, %v2268_v52 }
 0x3d8   : > { %2440 = vmatprep.mubr.bf16.mxu0 %v2979_v2  ;;  %v2388_v16 = vpop.permute.xlu0 %2387 }
 0x3d9   : > { %v2331_v14 = vpack.c.bf16 %v2329_v55, %v2327_v59  ;;  %v2390_v15 = vpop.permute.xlu1 %2389  ;;  %v2332_v19 = vpack.c.bf16 %v2330_v57, %v2328_v9 }
 0x3db   : > { %2344 = vmatprep.subr.bf16.mxu1 %v2332_v19 }
 0x3dc   : > { %2345 = vmatpush1.bf16.msra.mxu1 %v2331_v14  ;;  %v2392_v17 = vpop.permute.xlu0 %2391 }
 0x3dd   : > { %v2394_v26 = vpop.permute.xlu1 %2393  ;;  %v2395_v37 = vsel %vm977_vm10, %v2388_v16, %v2392_v17  ;;  %v2397_v2 = vsel %vm977_vm10, %v2392_v17, %v2388_v16 }
 0x3de   : > { %v2396_v21 = vsel %vm977_vm10, %v2390_v15, %v2394_v26  ;;  %v2398_v36 = vsel %vm977_vm10, %v2394_v26, %v2390_v15  ;;  %v2399_v56 = vmul.f32 %v3251_v7, %v2395_v37  ;;  %v2400_v30 = vmul.f32 %v3256_v8, %v2397_v2 }
 0x3df   : > { %v2401_v27 = vmul.f32 %v3251_v7, %v2396_v21  ;;  %v2402_v29 = vmul.f32 %v3256_v8, %v2398_v36  ;;  %2630 = vmatmul.mubr.msk.bf16.vlgmr.msra.gmra.mrb[12].mxu1 %vm1193_vm11, %v2340_v22 }
 0x3e1   : > { %v2403_v40 = vpack.c.bf16 %v2401_v27, %v2399_v56  ;;  %v2404_v33 = vpack.c.bf16 %v2402_v29, %v2400_v30 }
 0x3e3   : > { %2408 = vmatprep.subr.bf16.mxu0 %v2404_v33 }
 0x3e4   : > { %2409 = vmatpush1.bf16.msra.mxu0 %v2403_v40 }
 0x3e7   : > { %2631 = vmatmul.mubr.msk.bf16.vlgmr.msra.gmra.mrb[16].mxu0 %vm1193_vm11, %v1843_v41 }
 0x3ed   : > { %v2454_v15 = vpop.permute.xlu0 %2453 }
 0x482   : > { %v1930_v44 = vpop.f32.mrb[0].mxu0 }
 0x483   : > { %v1932_v34 = vpop.f32.mrb[1].mxu0 }
 0x484   : > { %v1934_v35 = vpop.f32.mrb[2].mxu0 }
 0x485   : > { %v1935_v38 = vpop.f32.mrb[3].mxu0 }
 0x48a   : > { %v1974_v58 = vpop.f32.mrb[0].mxu1 }
 0x48b   : > { %v1975_v7 = vadd.f32 %v1974_v58, %v1930_v44  ;;  %v1976_v42 = vpop.f32.mrb[1].mxu1 }
 0x48c   : > { %v1977_v8 = vadd.f32 %v1976_v42, %v1932_v34  ;;  %v1978_v18 = vpop.f32.mrb[2].mxu1 }
 0x48d   : > { %v1979_v43 = vpop.f32.mrb[3].mxu1 }
 0x492   : > { %v2040_v45 = vpop.f32.mrb[4].mxu0 }
 0x493   : > { %v2047_v20 = vadd.f32 %v2040_v45, %v1975_v7  ;;  %v2042_v60 = vpop.f32.mrb[5].mxu0 }
 0x494   : > { %v2048_v62 = vadd.f32 %v2042_v60, %v1977_v8  ;;  %v2044_v63 = vpop.f32.mrb[6].mxu0 }
 0x495   : > { %v2045_v0 = vpop.f32.mrb[7].mxu0 }
 0x49a   : > { %v2112_v1 = vpop.f32.mrb[4].mxu1  ;;  %v2165_v13 = vpop.f32.mrb[8].mxu0 }
 0x49b   : > { %v2119_v3 = vadd.f32 %v2112_v1, %v2047_v20  ;;  %v2114_v12 = vpop.f32.mrb[5].mxu1  ;;  %v2167_v11 = vpop.f32.mrb[9].mxu0 }
 0x49c   : > { %v2120_v4 = vadd.f32 %v2114_v12, %v2048_v62  ;;  %v2116_v28 = vpop.f32.mrb[6].mxu1  ;;  %v2169_v6 = vpop.f32.mrb[10].mxu0 }
 0x49d   : > { %v2172_v47 = vadd.f32 %v2165_v13, %v2119_v3  ;;  %v2117_v5 = vpop.f32.mrb[7].mxu1  ;;  %v2170_v49 = vpop.f32.mrb[11].mxu0 }
 0x49e   : > { %v2173_v48 = vadd.f32 %v2167_v11, %v2120_v4 }
 0x4a2   : > { %v2240_v50 = vpop.f32.mrb[8].mxu1 }
 0x4a3   : > { %v2247_v51 = vadd.f32 %v2240_v50, %v2172_v47  ;;  %v2242_v31 = vpop.f32.mrb[9].mxu1 }
 0x4a4   : > { %v2248_v32 = vadd.f32 %v2242_v31, %v2173_v48  ;;  %v2244_v61 = vpop.f32.mrb[10].mxu1 }
 0x4a5   : > { %v2245_v52 = vpop.f32.mrb[11].mxu1 }
 0x4aa   : > { %v2306_v53 = vpop.f32.mrb[12].mxu0 }
 0x4ab   : > { %v2313_v39 = vadd.f32 %v2306_v53, %v2247_v51  ;;  %v2308_v23 = vpop.f32.mrb[13].mxu0 }
 0x4ac   : > { %v2314_v10 = vadd.f32 %v2308_v23, %v2248_v32  ;;  %v2310_v24 = vpop.f32.mrb[14].mxu0 }
 0x4ad   : > { %v2311_v25 = vpop.f32.mrb[15].mxu0 }
 0x4b2   : > { %v2378_v46 = vpop.f32.mrb[12].mxu1 }
 0x4b3   : > { %v2385_v54 = vadd.f32 %v2378_v46, %v2313_v39  ;;  %v2380_v55 = vpop.f32.mrb[13].mxu1 }
 0x4b4   : > { %v2386_v57 = vadd.f32 %v2380_v55, %v2314_v10  ;;  %v2382_v59 = vpop.f32.mrb[14].mxu1 }
 0x4b5   : > { %v2383_v9 = vpop.f32.mrb[15].mxu1 }
 0x4ba   : > { %v2442_v14 = vpop.f32.mrb[16].mxu0 }
 0x4bb   : > { %v2449_v16 = vadd.f32 %v2442_v14, %v2385_v54  ;;  %v2444_v19 = vpop.f32.mrb[17].mxu0 }
 0x4bc   : > { %v2450_v22 = vadd.f32 %v2444_v19, %v2386_v57  ;;  %v2446_v26 = vpop.f32.mrb[18].mxu0 }
 0x4bd   : > { %v2456_v17 = vadd.f32 %v2454_v15, %v2449_v16  ;;  %v2447_v21 = vpop.f32.mrb[19].mxu0 }
 0x4be   : > { %v2457_v36 = vadd.f32 %v2454_v15, %v2450_v22 }
 0x4c0   : > { %v2460_v37 = vcombine.low %v2456_v17, %v2457_v36 }
 0x4c2   : > { %2462 = vst [vmem:[%s3078_s17] sm:$0x77] %v2460_v37 }
 0x4c3 PF: > { %s18_s27 = sadd.s32 1, %s2925_s27  }
 0x4c4   : > { %p15_p13 = scmp.ge.s32.totalorder %s18_s27, 4  }
 0x4c6   :  { %17 = sbr.rel (!%p15_p13) target bundleno = 1 (0x1), region = 102 }

</bundles_post_ra>
